<compile_context>
chip_gen: v5e
topology: v5e:2x2
jax: 0.10.0
libtpu: 0.0.40
codegen_flags: <defaults>
</compile_context>

<pallas_src>
import math
from functools import partial

import jax
import jax.numpy as jnp
from jax import lax
from jax.experimental import pallas as pl
from jax.experimental.pallas import tpu as pltpu

_LN3 = math.log(3.0)
_INV_SQRT_2PI = 1.0 / math.sqrt(2.0 * math.pi)


# ---------------------------------------------------------------------------
# Fused kernel: projections + attention + Gaussian prior + out projection
# ---------------------------------------------------------------------------
def _mael_attention_kernel(q_ref, k_ref, v_ref,
                           wqs_ref, bqs_ref, wk_ref, bk_ref, wv_ref, bv_ref,
                           wo_ref, bo_ref,
                           out_ref, series_ref, prior_ref,
                           qh_scr, kh_scr, vh_scr, o2_scr,
                           *, n_heads, d_head, d_val):
    L = q_ref.shape[1]
    S = k_ref.shape[1]
    HE = n_heads * d_head
    f32, bf16 = jnp.float32, jnp.bfloat16

    xq = q_ref[0]                                   # (L, D)
    xk = k_ref[0]                                   # (S, D)
    xv = v_ref[0]                                   # (S, D)

    # --- fused projections (bf16 MXU operands, f32 accumulation) -----------
    # Wq columns are pre-scaled by 1/sqrt(E) in the wrapper; sigma projection
    # shares the LHS with Q so it comes out of the same matmul.
    qs = jnp.dot(xq.astype(bf16), wqs_ref[...],
                 preferred_element_type=f32) + bqs_ref[...]      # (L, HE + H)
    kk = jnp.dot(xk.astype(bf16), wk_ref[...],
                 preferred_element_type=f32) + bk_ref[...]       # (S, HE)
    vv = jnp.dot(xv.astype(bf16), wv_ref[...],
                 preferred_element_type=f32) + bv_ref[...]       # (S, H*Dv)

    sig = qs[:, HE:HE + n_heads]                                 # (L, H) f32
    sig = 1.0 / (1.0 + jnp.exp(-5.0 * sig)) + 1e-5               # sigmoid(5x)+eps
    sig = jnp.exp(sig * _LN3) - 1.0                              # 3**x - 1

    # squared |l - s| distances (VPU, f32) -- computed once per batch element
    li = lax.broadcasted_iota(jnp.int32, (L, S), 0)
    si = lax.broadcasted_iota(jnp.int32, (L, S), 1)
    dist2 = ((li - si) * (li - si)).astype(f32)                  # (L, S)

    # --- head-major staging + per-head Gaussian prior -----------------------
    # (only layout copies and element-wise math here; every matmul below is a
    #  single head-batched MXU einsum, not a per-head loop)
    for h in range(n_heads):
        qh_scr[h] = qs[:, h * d_head:(h + 1) * d_head].astype(bf16)
        kh_scr[h] = kk[:, h * d_head:(h + 1) * d_head].astype(bf16)
        vh_scr[h] = vv[:, h * d_val:(h + 1) * d_val].astype(bf16)

        # prior: all big divides replaced by per-row reciprocals + multiplies
        sig_h = sig[:, h:h + 1]                                  # (L, 1)
        inv_sig = 1.0 / sig_h                                    # (L, 1)
        coef = _INV_SQRT_2PI * inv_sig                           # (L, 1)
        neg_half_inv2 = -0.5 * inv_sig * inv_sig                 # (L, 1)
        prior_h = coef * jnp.exp(dist2 * neg_half_inv2)          # (L, S)
        prior_ref[0, h] = prior_h.astype(prior_ref.dtype)

    qh = qh_scr[...]                                             # (H, L, E)  bf16
    kh = kh_scr[...]                                             # (H, S, E)  bf16
    vh = vh_scr[...]                                             # (H, S, Dv) bf16

    # --- scaled dot-product attention, batched over heads -------------------
    # (scale already folded into Wq, so scores need no extra multiply)
    scores = jnp.einsum('hle,hse->hls', qh, kh,
                        preferred_element_type=f32)              # (H, L, S) f32
    m = jnp.max(scores, axis=-1, keepdims=True)
    p = jnp.exp(scores - m)
    denom = jnp.sum(p, axis=-1, keepdims=True)                   # (H, L, 1)
    series = p * (1.0 / denom)                                   # softmax, f32
    series_ref[0] = series.astype(series_ref.dtype)

    oh = jnp.einsum('hls,hsd->hld', series.astype(bf16), vh,
                    preferred_element_type=f32)                  # (H, L, Dv)

    # flatten heads back to (L, H*Dv) (layout copies), then out projection
    for h in range(n_heads):
        o2_scr[:, h * d_val:(h + 1) * d_val] = oh[h].astype(bf16)
    out = jnp.dot(o2_scr[...], wo_ref[...],
                  preferred_element_type=f32) + bo_ref[...]      # (L, D) f32
    out_ref[0] = out.astype(out_ref.dtype)


# ---------------------------------------------------------------------------
# Wrapper (single pallas_call over a parallel batch grid)
# ---------------------------------------------------------------------------
def mael_attention_layer(params, queries, keys, values, attn_mask=None,
                         tau=None, delta=None, *, n_heads):
    # TODO(synk): inner_attention is a constructor argument of the PyTorch
    # module; we implement AnomalyAttention (mask_flag=False,
    # output_attention=True, eval-mode dropout), so attn_mask/tau/delta are
    # unused.  L == S == win_size is assumed (as in the reference usage).
    del attn_mask, tau, delta
    B, L, D = queries.shape
    _, S, _ = keys.shape
    H = n_heads
    d_head = params["wq"].shape[1] // H
    d_val = params["wv"].shape[1] // H
    HE, HD = H * d_head, H * d_val
    f32, bf16 = jnp.float32, jnp.bfloat16
    scale = 1.0 / math.sqrt(d_head)

    # fold 1/sqrt(E) into the Q projection, fuse Q and sigma projections
    # (same LHS); weights become bf16 MXU operands, biases stay f32.
    w_qs = jnp.concatenate([params["wq"] * scale, params["wsig"]],
                           axis=1).astype(bf16)
    b_qs = jnp.concatenate([params["bq"] * scale, params["bsig"]],
                           axis=0).reshape(1, HE + H).astype(f32)
    wk = params["wk"].astype(bf16)
    bk = params["bk"].reshape(1, HE).astype(f32)
    wv = params["wv"].astype(bf16)
    bv = params["bv"].reshape(1, HD).astype(f32)
    wo = params["wo"].astype(bf16)
    bo = params["bo"].reshape(1, D).astype(f32)

    kernel = partial(_mael_attention_kernel,
                     n_heads=H, d_head=d_head, d_val=d_val)

    def wspec(r, c):
        return pl.BlockSpec((r, c), lambda b: (0, 0))

    out, series, prior = pl.pallas_call(
        kernel,
        out_shape=(
            jax.ShapeDtypeStruct((B, L, D), f32),
            jax.ShapeDtypeStruct((B, H, L, S), f32),
            jax.ShapeDtypeStruct((B, H, L, S), f32),
        ),
        grid=(B,),
        in_specs=[
            pl.BlockSpec((1, L, D), lambda b: (b, 0, 0)),    # queries
            pl.BlockSpec((1, S, D), lambda b: (b, 0, 0)),    # keys
            pl.BlockSpec((1, S, D), lambda b: (b, 0, 0)),    # values
            wspec(D, HE + H), wspec(1, HE + H),              # Wq*scale|Wsig, bq*scale|bsig
            wspec(D, HE), wspec(1, HE),                      # Wk, bk
            wspec(D, HD), wspec(1, HD),                      # Wv, bv
            wspec(HD, D), wspec(1, D),                       # Wo, bo
        ],
        out_specs=(
            pl.BlockSpec((1, L, D), lambda b: (b, 0, 0)),
            pl.BlockSpec((1, H, L, S), lambda b: (b, 0, 0, 0)),
            pl.BlockSpec((1, H, L, S), lambda b: (b, 0, 0, 0)),
        ),
        scratch_shapes=[
            pltpu.VMEM((H, L, d_head), bf16),                # Q, head-major
            pltpu.VMEM((H, S, d_head), bf16),                # K, head-major
            pltpu.VMEM((H, S, d_val), bf16),                 # V, head-major
            pltpu.VMEM((L, HD), bf16),                       # attn out, flat
        ],
        compiler_params=pltpu.CompilerParams(
            dimension_semantics=("parallel",)),
    )(queries, keys, values, w_qs, b_qs, wk, bk, wv, bv, wo, bo)
    return out, series, prior


# ---------------------------------------------------------------------------
# Deterministic synthetic parameters (Linear layers in (in, out) layout)
# ---------------------------------------------------------------------------
def init_params(key, d_model, n_heads, d_keys=None, d_values=None):
    d_keys = d_keys or d_model // n_heads
    d_values = d_values or d_model // n_heads
    ks = jax.random.split(key, 10)
    s = 0.05

    def lin(kw, kb, din, dout):
        return (s * jax.random.normal(kw, (din, dout), jnp.float32),
                s * jax.random.normal(kb, (dout,), jnp.float32))

    wq, bq = lin(ks[0], ks[1], d_model, d_keys * n_heads)
    wk, bk = lin(ks[2], ks[3], d_model, d_keys * n_heads)
    wv, bv = lin(ks[4], ks[5], d_model, d_values * n_heads)
    wsig, bsig = lin(ks[6], ks[7], d_model, n_heads)
    wo, bo = lin(ks[8], ks[9], d_values * n_heads, d_model)
    return dict(wq=wq, bq=bq, wk=wk, bk=bk, wv=wv, bv=bv,
                wsig=wsig, bsig=bsig, wo=wo, bo=bo)


# ---------------------------------------------------------------------------
# Plain-JAX reference (same bf16-operand / f32-accumulate math) for testing
# ---------------------------------------------------------------------------
def _reference_forward(params, queries, keys, values, n_heads):
    f32, bf16 = jnp.float32, jnp.bfloat16
    B, L, _ = queries.shape
    S = keys.shape[1]
    H = n_heads
    E = params["wq"].shape[1] // H
    Dv = params["wv"].shape[1] // H

    def proj(x, w, b):
        return jnp.einsum('bld,do->blo', x.astype(bf16), w.astype(bf16),
                          preferred_element_type=f32) + b

    q = proj(queries, params["wq"], params["bq"])
    k = proj(keys, params["wk"], params["bk"])
    v = proj(values, params["wv"], params["bv"])
    sig = proj(queries, params["wsig"], params["bsig"])          # (B, L, H)

    qh = q.reshape(B, L, H, E).transpose(0, 2, 1, 3)
    kh = k.reshape(B, S, H, E).transpose(0, 2, 1, 3)
    vh = v.reshape(B, S, H, Dv).transpose(0, 2, 1, 3)

    scores = jnp.einsum('bhle,bhse->bhls', qh.astype(bf16), kh.astype(bf16),
                        preferred_element_type=f32) / math.sqrt(E)
    series = jax.nn.softmax(scores, axis=-1)

    sig_t = jnp.transpose(sig, (0, 2, 1))                        # (B, H, L)
    sig_t = 1.0 / (1.0 + jnp.exp(-5.0 * sig_t)) + 1e-5
    sig_t = jnp.exp(sig_t * _LN3) - 1.0
    li = jnp.arange(L, dtype=f32)[:, None]
    si = jnp.arange(S, dtype=f32)[None, :]
    dist2 = (li - si) ** 2
    sig4 = sig_t[..., None]                                      # (B, H, L, 1)
    prior = (_INV_SQRT_2PI / sig4) * jnp.exp(-dist2 / (2.0 * sig4 * sig4))

    oh = jnp.einsum('bhls,bshd->bhld', series.astype(bf16),
                    vh.transpose(0, 2, 1, 3).astype(bf16),
                    preferred_element_type=f32)
    o2 = oh.transpose(0, 2, 1, 3).reshape(B, L, H * Dv)
    out = jnp.einsum('blk,km->blm', o2.astype(bf16),
                     params["wo"].astype(bf16),
                     preferred_element_type=f32) + params["bo"]
    return out, series, prior


if __name__ == "__main__":
    B, win_size, d_model, n_heads = 2, 32, 32, 4

    key = jax.random.PRNGKey(0)
    kp, kx = jax.random.split(key)
    params = init_params(kp, d_model, n_heads)
    x = jax.random.normal(kx, (B, win_size, d_model), jnp.float32)

    fwd = jax.jit(lambda p, q, k, v: mael_attention_layer(p, q, k, v,
                                                          n_heads=n_heads))
    out, series, prior = fwd(params, x, x, x)
    jax.block_until_ready((out, series, prior))

    assert out.shape == (B, win_size, d_model)
    assert series.shape == (B, n_heads, win_size, win_size)
    assert prior.shape == (B, n_heads, win_size, win_size)

    ref_out, ref_series, ref_prior = _reference_forward(params, x, x, x, n_heads)
    for name, got, ref in (("out", out, ref_out),
                           ("series", series, ref_series),
                           ("prior", prior, ref_prior)):
        err = float(jnp.max(jnp.abs(got - ref)))
        assert jnp.allclose(got, ref, rtol=1e-2, atol=1e-3), (
            f"{name} mismatch, max abs err {err:.3e}")

    print("KERNEL_OK")
</pallas_src>

<mosaic_0001>
module attributes {stable_mosaic.version = 11 : i64} {
  func.func @_mael_attention_kernel(%arg0: i32, %arg1: memref<1x32x32xf32, #tpu.memory_space<vmem>>, %arg2: memref<1x32x32xf32, #tpu.memory_space<vmem>>, %arg3: memref<1x32x32xf32, #tpu.memory_space<vmem>>, %arg4: memref<32x36xbf16, #tpu.memory_space<vmem>>, %arg5: memref<1x36xf32, #tpu.memory_space<vmem>>, %arg6: memref<32x32xbf16, #tpu.memory_space<vmem>>, %arg7: memref<1x32xf32, #tpu.memory_space<vmem>>, %arg8: memref<32x32xbf16, #tpu.memory_space<vmem>>, %arg9: memref<1x32xf32, #tpu.memory_space<vmem>>, %arg10: memref<32x32xbf16, #tpu.memory_space<vmem>>, %arg11: memref<1x32xf32, #tpu.memory_space<vmem>>, %arg12: memref<1x32x32xf32, #tpu.memory_space<vmem>>, %arg13: memref<1x4x32x32xf32, #tpu.memory_space<vmem>>, %arg14: memref<1x4x32x32xf32, #tpu.memory_space<vmem>>, %arg15: memref<4x32x8xbf16, #tpu.memory_space<vmem>>, %arg16: memref<4x32x8xbf16, #tpu.memory_space<vmem>>, %arg17: memref<4x32x8xbf16, #tpu.memory_space<vmem>>, %arg18: memref<32x32xbf16, #tpu.memory_space<vmem>>) attributes {dimension_semantics = [#tpu.dimension_semantics<parallel>], iteration_bounds = array<i64: 2>, scalar_prefetch = 0 : i64, scratch_operands = 4 : i64, tpu.core_type = #tpu.core_type<tc>, window_params = [{transform_indices = @transform_0, window_bounds = array<i64: 1, 32, 32>}, {transform_indices = @transform_1, window_bounds = array<i64: 1, 32, 32>}, {transform_indices = @transform_2, window_bounds = array<i64: 1, 32, 32>}, {pipeline_mode = #tpu.pipeline_mode<synchronous>, transform_indices = @transform_3, window_bounds = array<i64: 32, 36>}, {pipeline_mode = #tpu.pipeline_mode<synchronous>, transform_indices = @transform_4, window_bounds = array<i64: 1, 36>}, {pipeline_mode = #tpu.pipeline_mode<synchronous>, transform_indices = @transform_5, window_bounds = array<i64: 32, 32>}, {pipeline_mode = #tpu.pipeline_mode<synchronous>, transform_indices = @transform_6, window_bounds = array<i64: 1, 32>}, {pipeline_mode = #tpu.pipeline_mode<synchronous>, transform_indices = @transform_7, window_bounds = array<i64: 32, 32>}, {pipeline_mode = #tpu.pipeline_mode<synchronous>, transform_indices = @transform_8, window_bounds = array<i64: 1, 32>}, {pipeline_mode = #tpu.pipeline_mode<synchronous>, transform_indices = @transform_9, window_bounds = array<i64: 32, 32>}, {pipeline_mode = #tpu.pipeline_mode<synchronous>, transform_indices = @transform_10, window_bounds = array<i64: 1, 32>}, {transform_indices = @transform_11, window_bounds = array<i64: 1, 32, 32>}, {transform_indices = @transform_12, window_bounds = array<i64: 1, 4, 32, 32>}, {transform_indices = @transform_13, window_bounds = array<i64: 1, 4, 32, 32>}]} {
    %c0 = arith.constant 0 : index
    %c0_0 = arith.constant 0 : index
    %c0_1 = arith.constant 0 : index
    %0 = vector.load %arg1[%c0, %c0_0, %c0_1] : memref<1x32x32xf32, #tpu.memory_space<vmem>>, vector<1x32x32xf32>
    %1 = vector.shape_cast %0 : vector<1x32x32xf32> to vector<32x32xf32>
    %c0_2 = arith.constant 0 : index
    %c0_3 = arith.constant 0 : index
    %c0_4 = arith.constant 0 : index
    %2 = vector.load %arg2[%c0_2, %c0_3, %c0_4] : memref<1x32x32xf32, #tpu.memory_space<vmem>>, vector<1x32x32xf32>
    %3 = vector.shape_cast %2 : vector<1x32x32xf32> to vector<32x32xf32>
    %c0_5 = arith.constant 0 : index
    %c0_6 = arith.constant 0 : index
    %c0_7 = arith.constant 0 : index
    %4 = vector.load %arg3[%c0_5, %c0_6, %c0_7] : memref<1x32x32xf32, #tpu.memory_space<vmem>>, vector<1x32x32xf32>
    %5 = vector.shape_cast %4 : vector<1x32x32xf32> to vector<32x32xf32>
    %6 = arith.truncf %1 : vector<32x32xf32> to vector<32x32xbf16>
    %c0_8 = arith.constant 0 : index
    %c0_9 = arith.constant 0 : index
    %7 = vector.load %arg4[%c0_8, %c0_9] : memref<32x36xbf16, #tpu.memory_space<vmem>>, vector<32x36xbf16>
    %cst = arith.constant dense<0.000000e+00> : vector<32x36xf32>
    %8 = tpu.matmul %6, %7, %cst {dimension_numbers = #tpu.dot_dimension_numbers<[1], [0], [0], [1], [0, 0, 1, 1], [], []>} : vector<32x32xbf16>, vector<32x36xbf16>, vector<32x36xf32> -> vector<32x36xf32>
    %c0_10 = arith.constant 0 : index
    %c0_11 = arith.constant 0 : index
    %9 = vector.load %arg5[%c0_10, %c0_11] : memref<1x36xf32, #tpu.memory_space<vmem>>, vector<1x36xf32>
    %10 = vector.broadcast %9 : vector<1x36xf32> to vector<32x36xf32>
    %11 = arith.addf %8, %10 : vector<32x36xf32>
    %12 = arith.truncf %3 : vector<32x32xf32> to vector<32x32xbf16>
    %c0_12 = arith.constant 0 : index
    %c0_13 = arith.constant 0 : index
    %13 = vector.load %arg6[%c0_12, %c0_13] : memref<32x32xbf16, #tpu.memory_space<vmem>>, vector<32x32xbf16>
    %cst_14 = arith.constant dense<0.000000e+00> : vector<32x32xf32>
    %14 = tpu.matmul %12, %13, %cst_14 {dimension_numbers = #tpu.dot_dimension_numbers<[1], [0], [0], [1], [0, 0, 1, 1], [], []>} : vector<32x32xbf16>, vector<32x32xbf16>, vector<32x32xf32> -> vector<32x32xf32>
    %c0_15 = arith.constant 0 : index
    %c0_16 = arith.constant 0 : index
    %15 = vector.load %arg7[%c0_15, %c0_16] : memref<1x32xf32, #tpu.memory_space<vmem>>, vector<1x32xf32>
    %16 = vector.broadcast %15 : vector<1x32xf32> to vector<32x32xf32>
    %17 = arith.addf %14, %16 : vector<32x32xf32>
    %18 = arith.truncf %5 : vector<32x32xf32> to vector<32x32xbf16>
    %c0_17 = arith.constant 0 : index
    %c0_18 = arith.constant 0 : index
    %19 = vector.load %arg8[%c0_17, %c0_18] : memref<32x32xbf16, #tpu.memory_space<vmem>>, vector<32x32xbf16>
    %cst_19 = arith.constant dense<0.000000e+00> : vector<32x32xf32>
    %20 = tpu.matmul %18, %19, %cst_19 {dimension_numbers = #tpu.dot_dimension_numbers<[1], [0], [0], [1], [0, 0, 1, 1], [], []>} : vector<32x32xbf16>, vector<32x32xbf16>, vector<32x32xf32> -> vector<32x32xf32>
    %c0_20 = arith.constant 0 : index
    %c0_21 = arith.constant 0 : index
    %21 = vector.load %arg9[%c0_20, %c0_21] : memref<1x32xf32, #tpu.memory_space<vmem>>, vector<1x32xf32>
    %22 = vector.broadcast %21 : vector<1x32xf32> to vector<32x32xf32>
    %23 = arith.addf %20, %22 : vector<32x32xf32>
    %24 = vector.extract_strided_slice %11 {offsets = [0, 32], sizes = [32, 4], strides = [1, 1]} : vector<32x36xf32> to vector<32x4xf32>
    %cst_22 = arith.constant -5.000000e+00 : f32
    %25 = vector.broadcast %cst_22 : f32 to vector<32x4xf32>
    %26 = arith.mulf %25, %24 : vector<32x4xf32>
    %27 = math.exp %26 : vector<32x4xf32>
    %cst_23 = arith.constant 1.000000e+00 : f32
    %28 = vector.broadcast %cst_23 : f32 to vector<32x4xf32>
    %29 = arith.addf %28, %27 : vector<32x4xf32>
    %cst_24 = arith.constant 1.000000e+00 : f32
    %30 = vector.broadcast %cst_24 : f32 to vector<32x4xf32>
    %31 = arith.divf %30, %29 : vector<32x4xf32>
    %cst_25 = arith.constant 9.99999974E-6 : f32
    %32 = vector.broadcast %cst_25 : f32 to vector<32x4xf32>
    %33 = arith.addf %31, %32 : vector<32x4xf32>
    %cst_26 = arith.constant 1.09861231 : f32
    %34 = vector.broadcast %cst_26 : f32 to vector<32x4xf32>
    %35 = arith.mulf %33, %34 : vector<32x4xf32>
    %36 = math.exp %35 : vector<32x4xf32>
    %cst_27 = arith.constant 1.000000e+00 : f32
    %37 = vector.broadcast %cst_27 : f32 to vector<32x4xf32>
    %38 = arith.subf %36, %37 : vector<32x4xf32>
    %39 = tpu.iota {dimensions = array<i32: 0>} : vector<32x32xi32>
    %40 = tpu.iota {dimensions = array<i32: 1>} : vector<32x32xi32>
    %41 = arith.subi %39, %40 : vector<32x32xi32>
    %42 = arith.subi %39, %40 : vector<32x32xi32>
    %43 = arith.muli %41, %42 : vector<32x32xi32>
    %44 = arith.sitofp %43 : vector<32x32xi32> to vector<32x32xf32>
    %45 = vector.extract_strided_slice %11 {offsets = [0, 0], sizes = [32, 8], strides = [1, 1]} : vector<32x36xf32> to vector<32x8xf32>
    %46 = arith.truncf %45 : vector<32x8xf32> to vector<32x8xbf16>
    %c0_28 = arith.constant 0 : index
    %c0_29 = arith.constant 0 : index
    %c0_30 = arith.constant 0 : index
    %47 = vector.load %arg15[%c0_28, %c0_29, %c0_30] : memref<4x32x8xbf16, #tpu.memory_space<vmem>>, vector<1x32x8xbf16>
    %48 = vector.shape_cast %47 : vector<1x32x8xbf16> to vector<32x8xbf16>
    %49 = vector.shape_cast %46 : vector<32x8xbf16> to vector<1x32x8xbf16>
    tpu.vector_store %arg15[%c0_28, %c0_29, %c0_30], %49 {strides = array<i32>} : memref<4x32x8xbf16, #tpu.memory_space<vmem>>, vector<1x32x8xbf16>,
    %50 = vector.extract_strided_slice %17 {offsets = [0, 0], sizes = [32, 8], strides = [1, 1]} : vector<32x32xf32> to vector<32x8xf32>
    %51 = arith.truncf %50 : vector<32x8xf32> to vector<32x8xbf16>
    %c0_31 = arith.constant 0 : index
    %c0_32 = arith.constant 0 : index
    %c0_33 = arith.constant 0 : index
    %52 = vector.load %arg16[%c0_31, %c0_32, %c0_33] : memref<4x32x8xbf16, #tpu.memory_space<vmem>>, vector<1x32x8xbf16>
    %53 = vector.shape_cast %52 : vector<1x32x8xbf16> to vector<32x8xbf16>
    %54 = vector.shape_cast %51 : vector<32x8xbf16> to vector<1x32x8xbf16>
    tpu.vector_store %arg16[%c0_31, %c0_32, %c0_33], %54 {strides = array<i32>} : memref<4x32x8xbf16, #tpu.memory_space<vmem>>, vector<1x32x8xbf16>,
    %55 = vector.extract_strided_slice %23 {offsets = [0, 0], sizes = [32, 8], strides = [1, 1]} : vector<32x32xf32> to vector<32x8xf32>
    %56 = arith.truncf %55 : vector<32x8xf32> to vector<32x8xbf16>
    %c0_34 = arith.constant 0 : index
    %c0_35 = arith.constant 0 : index
    %c0_36 = arith.constant 0 : index
    %57 = vector.load %arg17[%c0_34, %c0_35, %c0_36] : memref<4x32x8xbf16, #tpu.memory_space<vmem>>, vector<1x32x8xbf16>
    %58 = vector.shape_cast %57 : vector<1x32x8xbf16> to vector<32x8xbf16>
    %59 = vector.shape_cast %56 : vector<32x8xbf16> to vector<1x32x8xbf16>
    tpu.vector_store %arg17[%c0_34, %c0_35, %c0_36], %59 {strides = array<i32>} : memref<4x32x8xbf16, #tpu.memory_space<vmem>>, vector<1x32x8xbf16>,
    %60 = vector.extract_strided_slice %38 {offsets = [0, 0], sizes = [32, 1], strides = [1, 1]} : vector<32x4xf32> to vector<32x1xf32>
    %cst_37 = arith.constant 1.000000e+00 : f32
    %61 = vector.broadcast %cst_37 : f32 to vector<32x1xf32>
    %62 = arith.divf %61, %60 : vector<32x1xf32>
    %cst_38 = arith.constant 0.398942292 : f32
    %63 = vector.broadcast %cst_38 : f32 to vector<32x1xf32>
    %64 = arith.mulf %63, %62 : vector<32x1xf32>
    %cst_39 = arith.constant -5.000000e-01 : f32
    %65 = vector.broadcast %cst_39 : f32 to vector<32x1xf32>
    %66 = arith.mulf %65, %62 : vector<32x1xf32>
    %67 = arith.mulf %66, %62 : vector<32x1xf32>
    %68 = vector.broadcast %67 : vector<32x1xf32> to vector<32x32xf32>
    %69 = arith.mulf %44, %68 : vector<32x32xf32>
    %70 = math.exp %69 : vector<32x32xf32>
    %71 = vector.broadcast %64 : vector<32x1xf32> to vector<32x32xf32>
    %72 = arith.mulf %71, %70 : vector<32x32xf32>
    %c0_40 = arith.constant 0 : index
    %c0_41 = arith.constant 0 : index
    %c0_42 = arith.constant 0 : index
    %c0_43 = arith.constant 0 : index
    %73 = vector.load %arg14[%c0_40, %c0_41, %c0_42, %c0_43] : memref<1x4x32x32xf32, #tpu.memory_space<vmem>>, vector<1x1x32x32xf32>
    %74 = vector.shape_cast %73 : vector<1x1x32x32xf32> to vector<32x32xf32>
    %75 = vector.shape_cast %72 : vector<32x32xf32> to vector<1x1x32x32xf32>
    tpu.vector_store %arg14[%c0_40, %c0_41, %c0_42, %c0_43], %75 {strides = array<i32>} : memref<1x4x32x32xf32, #tpu.memory_space<vmem>>, vector<1x1x32x32xf32>,
    %76 = vector.extract_strided_slice %11 {offsets = [0, 8], sizes = [32, 8], strides = [1, 1]} : vector<32x36xf32> to vector<32x8xf32>
    %77 = arith.truncf %76 : vector<32x8xf32> to vector<32x8xbf16>
    %c1 = arith.constant 1 : index
    %c0_44 = arith.constant 0 : index
    %c0_45 = arith.constant 0 : index
    %78 = vector.load %arg15[%c1, %c0_44, %c0_45] : memref<4x32x8xbf16, #tpu.memory_space<vmem>>, vector<1x32x8xbf16>
    %79 = vector.shape_cast %78 : vector<1x32x8xbf16> to vector<32x8xbf16>
    %80 = vector.shape_cast %77 : vector<32x8xbf16> to vector<1x32x8xbf16>
    tpu.vector_store %arg15[%c1, %c0_44, %c0_45], %80 {strides = array<i32>} : memref<4x32x8xbf16, #tpu.memory_space<vmem>>, vector<1x32x8xbf16>,
    %81 = vector.extract_strided_slice %17 {offsets = [0, 8], sizes = [32, 8], strides = [1, 1]} : vector<32x32xf32> to vector<32x8xf32>
    %82 = arith.truncf %81 : vector<32x8xf32> to vector<32x8xbf16>
    %c1_46 = arith.constant 1 : index
    %c0_47 = arith.constant 0 : index
    %c0_48 = arith.constant 0 : index
    %83 = vector.load %arg16[%c1_46, %c0_47, %c0_48] : memref<4x32x8xbf16, #tpu.memory_space<vmem>>, vector<1x32x8xbf16>
    %84 = vector.shape_cast %83 : vector<1x32x8xbf16> to vector<32x8xbf16>
    %85 = vector.shape_cast %82 : vector<32x8xbf16> to vector<1x32x8xbf16>
    tpu.vector_store %arg16[%c1_46, %c0_47, %c0_48], %85 {strides = array<i32>} : memref<4x32x8xbf16, #tpu.memory_space<vmem>>, vector<1x32x8xbf16>,
    %86 = vector.extract_strided_slice %23 {offsets = [0, 8], sizes = [32, 8], strides = [1, 1]} : vector<32x32xf32> to vector<32x8xf32>
    %87 = arith.truncf %86 : vector<32x8xf32> to vector<32x8xbf16>
    %c1_49 = arith.constant 1 : index
    %c0_50 = arith.constant 0 : index
    %c0_51 = arith.constant 0 : index
    %88 = vector.load %arg17[%c1_49, %c0_50, %c0_51] : memref<4x32x8xbf16, #tpu.memory_space<vmem>>, vector<1x32x8xbf16>
    %89 = vector.shape_cast %88 : vector<1x32x8xbf16> to vector<32x8xbf16>
    %90 = vector.shape_cast %87 : vector<32x8xbf16> to vector<1x32x8xbf16>
    tpu.vector_store %arg17[%c1_49, %c0_50, %c0_51], %90 {strides = array<i32>} : memref<4x32x8xbf16, #tpu.memory_space<vmem>>, vector<1x32x8xbf16>,
    %91 = vector.extract_strided_slice %38 {offsets = [0, 1], sizes = [32, 1], strides = [1, 1]} : vector<32x4xf32> to vector<32x1xf32>
    %cst_52 = arith.constant 1.000000e+00 : f32
    %92 = vector.broadcast %cst_52 : f32 to vector<32x1xf32>
    %93 = arith.divf %92, %91 : vector<32x1xf32>
    %cst_53 = arith.constant 0.398942292 : f32
    %94 = vector.broadcast %cst_53 : f32 to vector<32x1xf32>
    %95 = arith.mulf %94, %93 : vector<32x1xf32>
    %cst_54 = arith.constant -5.000000e-01 : f32
    %96 = vector.broadcast %cst_54 : f32 to vector<32x1xf32>
    %97 = arith.mulf %96, %93 : vector<32x1xf32>
    %98 = arith.mulf %97, %93 : vector<32x1xf32>
    %99 = vector.broadcast %98 : vector<32x1xf32> to vector<32x32xf32>
    %100 = arith.mulf %44, %99 : vector<32x32xf32>
    %101 = math.exp %100 : vector<32x32xf32>
    %102 = vector.broadcast %95 : vector<32x1xf32> to vector<32x32xf32>
    %103 = arith.mulf %102, %101 : vector<32x32xf32>
    %c0_55 = arith.constant 0 : index
    %c1_56 = arith.constant 1 : index
    %c0_57 = arith.constant 0 : index
    %c0_58 = arith.constant 0 : index
    %104 = vector.load %arg14[%c0_55, %c1_56, %c0_57, %c0_58] : memref<1x4x32x32xf32, #tpu.memory_space<vmem>>, vector<1x1x32x32xf32>
    %105 = vector.shape_cast %104 : vector<1x1x32x32xf32> to vector<32x32xf32>
    %106 = vector.shape_cast %103 : vector<32x32xf32> to vector<1x1x32x32xf32>
    tpu.vector_store %arg14[%c0_55, %c1_56, %c0_57, %c0_58], %106 {strides = array<i32>} : memref<1x4x32x32xf32, #tpu.memory_space<vmem>>, vector<1x1x32x32xf32>,
    %107 = vector.extract_strided_slice %11 {offsets = [0, 16], sizes = [32, 8], strides = [1, 1]} : vector<32x36xf32> to vector<32x8xf32>
    %108 = arith.truncf %107 : vector<32x8xf32> to vector<32x8xbf16>
    %c2 = arith.constant 2 : index
    %c0_59 = arith.constant 0 : index
    %c0_60 = arith.constant 0 : index
    %109 = vector.load %arg15[%c2, %c0_59, %c0_60] : memref<4x32x8xbf16, #tpu.memory_space<vmem>>, vector<1x32x8xbf16>
    %110 = vector.shape_cast %109 : vector<1x32x8xbf16> to vector<32x8xbf16>
    %111 = vector.shape_cast %108 : vector<32x8xbf16> to vector<1x32x8xbf16>
    tpu.vector_store %arg15[%c2, %c0_59, %c0_60], %111 {strides = array<i32>} : memref<4x32x8xbf16, #tpu.memory_space<vmem>>, vector<1x32x8xbf16>,
    %112 = vector.extract_strided_slice %17 {offsets = [0, 16], sizes = [32, 8], strides = [1, 1]} : vector<32x32xf32> to vector<32x8xf32>
    %113 = arith.truncf %112 : vector<32x8xf32> to vector<32x8xbf16>
    %c2_61 = arith.constant 2 : index
    %c0_62 = arith.constant 0 : index
    %c0_63 = arith.constant 0 : index
    %114 = vector.load %arg16[%c2_61, %c0_62, %c0_63] : memref<4x32x8xbf16, #tpu.memory_space<vmem>>, vector<1x32x8xbf16>
    %115 = vector.shape_cast %114 : vector<1x32x8xbf16> to vector<32x8xbf16>
    %116 = vector.shape_cast %113 : vector<32x8xbf16> to vector<1x32x8xbf16>
    tpu.vector_store %arg16[%c2_61, %c0_62, %c0_63], %116 {strides = array<i32>} : memref<4x32x8xbf16, #tpu.memory_space<vmem>>, vector<1x32x8xbf16>,
    %117 = vector.extract_strided_slice %23 {offsets = [0, 16], sizes = [32, 8], strides = [1, 1]} : vector<32x32xf32> to vector<32x8xf32>
    %118 = arith.truncf %117 : vector<32x8xf32> to vector<32x8xbf16>
    %c2_64 = arith.constant 2 : index
    %c0_65 = arith.constant 0 : index
    %c0_66 = arith.constant 0 : index
    %119 = vector.load %arg17[%c2_64, %c0_65, %c0_66] : memref<4x32x8xbf16, #tpu.memory_space<vmem>>, vector<1x32x8xbf16>
    %120 = vector.shape_cast %119 : vector<1x32x8xbf16> to vector<32x8xbf16>
    %121 = vector.shape_cast %118 : vector<32x8xbf16> to vector<1x32x8xbf16>
    tpu.vector_store %arg17[%c2_64, %c0_65, %c0_66], %121 {strides = array<i32>} : memref<4x32x8xbf16, #tpu.memory_space<vmem>>, vector<1x32x8xbf16>,
    %122 = vector.extract_strided_slice %38 {offsets = [0, 2], sizes = [32, 1], strides = [1, 1]} : vector<32x4xf32> to vector<32x1xf32>
    %cst_67 = arith.constant 1.000000e+00 : f32
    %123 = vector.broadcast %cst_67 : f32 to vector<32x1xf32>
    %124 = arith.divf %123, %122 : vector<32x1xf32>
    %cst_68 = arith.constant 0.398942292 : f32
    %125 = vector.broadcast %cst_68 : f32 to vector<32x1xf32>
    %126 = arith.mulf %125, %124 : vector<32x1xf32>
    %cst_69 = arith.constant -5.000000e-01 : f32
    %127 = vector.broadcast %cst_69 : f32 to vector<32x1xf32>
    %128 = arith.mulf %127, %124 : vector<32x1xf32>
    %129 = arith.mulf %128, %124 : vector<32x1xf32>
    %130 = vector.broadcast %129 : vector<32x1xf32> to vector<32x32xf32>
    %131 = arith.mulf %44, %130 : vector<32x32xf32>
    %132 = math.exp %131 : vector<32x32xf32>
    %133 = vector.broadcast %126 : vector<32x1xf32> to vector<32x32xf32>
    %134 = arith.mulf %133, %132 : vector<32x32xf32>
    %c0_70 = arith.constant 0 : index
    %c2_71 = arith.constant 2 : index
    %c0_72 = arith.constant 0 : index
    %c0_73 = arith.constant 0 : index
    %135 = vector.load %arg14[%c0_70, %c2_71, %c0_72, %c0_73] : memref<1x4x32x32xf32, #tpu.memory_space<vmem>>, vector<1x1x32x32xf32>
    %136 = vector.shape_cast %135 : vector<1x1x32x32xf32> to vector<32x32xf32>
    %137 = vector.shape_cast %134 : vector<32x32xf32> to vector<1x1x32x32xf32>
    tpu.vector_store %arg14[%c0_70, %c2_71, %c0_72, %c0_73], %137 {strides = array<i32>} : memref<1x4x32x32xf32, #tpu.memory_space<vmem>>, vector<1x1x32x32xf32>,
    %138 = vector.extract_strided_slice %11 {offsets = [0, 24], sizes = [32, 8], strides = [1, 1]} : vector<32x36xf32> to vector<32x8xf32>
    %139 = arith.truncf %138 : vector<32x8xf32> to vector<32x8xbf16>
    %c3 = arith.constant 3 : index
    %c0_74 = arith.constant 0 : index
    %c0_75 = arith.constant 0 : index
    %140 = vector.load %arg15[%c3, %c0_74, %c0_75] : memref<4x32x8xbf16, #tpu.memory_space<vmem>>, vector<1x32x8xbf16>
    %141 = vector.shape_cast %140 : vector<1x32x8xbf16> to vector<32x8xbf16>
    %142 = vector.shape_cast %139 : vector<32x8xbf16> to vector<1x32x8xbf16>
    tpu.vector_store %arg15[%c3, %c0_74, %c0_75], %142 {strides = array<i32>} : memref<4x32x8xbf16, #tpu.memory_space<vmem>>, vector<1x32x8xbf16>,
    %143 = vector.extract_strided_slice %17 {offsets = [0, 24], sizes = [32, 8], strides = [1, 1]} : vector<32x32xf32> to vector<32x8xf32>
    %144 = arith.truncf %143 : vector<32x8xf32> to vector<32x8xbf16>
    %c3_76 = arith.constant 3 : index
    %c0_77 = arith.constant 0 : index
    %c0_78 = arith.constant 0 : index
    %145 = vector.load %arg16[%c3_76, %c0_77, %c0_78] : memref<4x32x8xbf16, #tpu.memory_space<vmem>>, vector<1x32x8xbf16>
    %146 = vector.shape_cast %145 : vector<1x32x8xbf16> to vector<32x8xbf16>
    %147 = vector.shape_cast %144 : vector<32x8xbf16> to vector<1x32x8xbf16>
    tpu.vector_store %arg16[%c3_76, %c0_77, %c0_78], %147 {strides = array<i32>} : memref<4x32x8xbf16, #tpu.memory_space<vmem>>, vector<1x32x8xbf16>,
    %148 = vector.extract_strided_slice %23 {offsets = [0, 24], sizes = [32, 8], strides = [1, 1]} : vector<32x32xf32> to vector<32x8xf32>
    %149 = arith.truncf %148 : vector<32x8xf32> to vector<32x8xbf16>
    %c3_79 = arith.constant 3 : index
    %c0_80 = arith.constant 0 : index
    %c0_81 = arith.constant 0 : index
    %150 = vector.load %arg17[%c3_79, %c0_80, %c0_81] : memref<4x32x8xbf16, #tpu.memory_space<vmem>>, vector<1x32x8xbf16>
    %151 = vector.shape_cast %150 : vector<1x32x8xbf16> to vector<32x8xbf16>
    %152 = vector.shape_cast %149 : vector<32x8xbf16> to vector<1x32x8xbf16>
    tpu.vector_store %arg17[%c3_79, %c0_80, %c0_81], %152 {strides = array<i32>} : memref<4x32x8xbf16, #tpu.memory_space<vmem>>, vector<1x32x8xbf16>,
    %153 = vector.extract_strided_slice %38 {offsets = [0, 3], sizes = [32, 1], strides = [1, 1]} : vector<32x4xf32> to vector<32x1xf32>
    %cst_82 = arith.constant 1.000000e+00 : f32
    %154 = vector.broadcast %cst_82 : f32 to vector<32x1xf32>
    %155 = arith.divf %154, %153 : vector<32x1xf32>
    %cst_83 = arith.constant 0.398942292 : f32
    %156 = vector.broadcast %cst_83 : f32 to vector<32x1xf32>
    %157 = arith.mulf %156, %155 : vector<32x1xf32>
    %cst_84 = arith.constant -5.000000e-01 : f32
    %158 = vector.broadcast %cst_84 : f32 to vector<32x1xf32>
    %159 = arith.mulf %158, %155 : vector<32x1xf32>
    %160 = arith.mulf %159, %155 : vector<32x1xf32>
    %161 = vector.broadcast %160 : vector<32x1xf32> to vector<32x32xf32>
    %162 = arith.mulf %44, %161 : vector<32x32xf32>
    %163 = math.exp %162 : vector<32x32xf32>
    %164 = vector.broadcast %157 : vector<32x1xf32> to vector<32x32xf32>
    %165 = arith.mulf %164, %163 : vector<32x32xf32>
    %c0_85 = arith.constant 0 : index
    %c3_86 = arith.constant 3 : index
    %c0_87 = arith.constant 0 : index
    %c0_88 = arith.constant 0 : index
    %166 = vector.load %arg14[%c0_85, %c3_86, %c0_87, %c0_88] : memref<1x4x32x32xf32, #tpu.memory_space<vmem>>, vector<1x1x32x32xf32>
    %167 = vector.shape_cast %166 : vector<1x1x32x32xf32> to vector<32x32xf32>
    %168 = vector.shape_cast %165 : vector<32x32xf32> to vector<1x1x32x32xf32>
    tpu.vector_store %arg14[%c0_85, %c3_86, %c0_87, %c0_88], %168 {strides = array<i32>} : memref<1x4x32x32xf32, #tpu.memory_space<vmem>>, vector<1x1x32x32xf32>,
    %c0_89 = arith.constant 0 : index
    %c0_90 = arith.constant 0 : index
    %c0_91 = arith.constant 0 : index
    %169 = vector.load %arg15[%c0_89, %c0_90, %c0_91] : memref<4x32x8xbf16, #tpu.memory_space<vmem>>, vector<4x32x8xbf16>
    %c0_92 = arith.constant 0 : index
    %c0_93 = arith.constant 0 : index
    %c0_94 = arith.constant 0 : index
    %170 = vector.load %arg16[%c0_92, %c0_93, %c0_94] : memref<4x32x8xbf16, #tpu.memory_space<vmem>>, vector<4x32x8xbf16>
    %c0_95 = arith.constant 0 : index
    %c0_96 = arith.constant 0 : index
    %c0_97 = arith.constant 0 : index
    %171 = vector.load %arg17[%c0_95, %c0_96, %c0_97] : memref<4x32x8xbf16, #tpu.memory_space<vmem>>, vector<4x32x8xbf16>
    "tpu.trace_start"() <{level = 10 : i32, message = "hle,hse->hls"}> : () -> ()
    %cst_98 = arith.constant dense<0.000000e+00> : vector<4x32x32xf32>
    %172 = tpu.matmul %169, %170, %cst_98 {dimension_numbers = #tpu.dot_dimension_numbers<[2], [2], [1], [1], [0, 0, 0, 1, 1, 1], [0], [0]>} : vector<4x32x8xbf16>, vector<4x32x8xbf16>, vector<4x32x32xf32> -> vector<4x32x32xf32>
    "tpu.trace_stop"() : () -> ()
    %cst_99 = arith.constant dense<0xFF800000> : vector<4x32xf32>
    %173 = vector.multi_reduction <maximumf>, %172, %cst_99 [2] : vector<4x32x32xf32> to vector<4x32xf32>
    %174 = vector.shape_cast %173 : vector<4x32xf32> to vector<4x32x1xf32>
    %175 = vector.broadcast %174 : vector<4x32x1xf32> to vector<4x32x32xf32>
    %176 = arith.subf %172, %175 : vector<4x32x32xf32>
    %177 = math.exp %176 : vector<4x32x32xf32>
    %cst_100 = arith.constant dense<0.000000e+00> : vector<4x32xf32>
    %178 = vector.multi_reduction <add>, %177, %cst_100 [2] : vector<4x32x32xf32> to vector<4x32xf32>
    %179 = vector.shape_cast %178 : vector<4x32xf32> to vector<4x32x1xf32>
    %cst_101 = arith.constant 1.000000e+00 : f32
    %180 = vector.broadcast %cst_101 : f32 to vector<4x32x1xf32>
    %181 = arith.divf %180, %179 : vector<4x32x1xf32>
    %182 = vector.broadcast %181 : vector<4x32x1xf32> to vector<4x32x32xf32>
    %183 = arith.mulf %177, %182 : vector<4x32x32xf32>
    %c0_102 = arith.constant 0 : index
    %c0_103 = arith.constant 0 : index
    %c0_104 = arith.constant 0 : index
    %c0_105 = arith.constant 0 : index
    %184 = vector.load %arg13[%c0_102, %c0_103, %c0_104, %c0_105] : memref<1x4x32x32xf32, #tpu.memory_space<vmem>>, vector<1x4x32x32xf32>
    %185 = vector.shape_cast %184 : vector<1x4x32x32xf32> to vector<4x32x32xf32>
    %186 = vector.shape_cast %183 : vector<4x32x32xf32> to vector<1x4x32x32xf32>
    tpu.vector_store %arg13[%c0_102, %c0_103, %c0_104, %c0_105], %186 {strides = array<i32>} : memref<1x4x32x32xf32, #tpu.memory_space<vmem>>, vector<1x4x32x32xf32>,
    %187 = arith.truncf %183 : vector<4x32x32xf32> to vector<4x32x32xbf16>
    "tpu.trace_start"() <{level = 10 : i32, message = "hls,hsd->hld"}> : () -> ()
    %cst_106 = arith.constant dense<0.000000e+00> : vector<4x32x8xf32>
    %188 = tpu.matmul %187, %171, %cst_106 {dimension_numbers = #tpu.dot_dimension_numbers<[2], [1], [1], [2], [0, 0, 0, 1, 1, 2], [0], [0]>} : vector<4x32x32xbf16>, vector<4x32x8xbf16>, vector<4x32x8xf32> -> vector<4x32x8xf32>
    "tpu.trace_stop"() : () -> ()
    %189 = vector.extract_strided_slice %188 {offsets = [0, 0, 0], sizes = [1, 32, 8], strides = [1, 1, 1]} : vector<4x32x8xf32> to vector<1x32x8xf32>
    %190 = vector.shape_cast %189 : vector<1x32x8xf32> to vector<32x8xf32>
    %191 = arith.truncf %190 : vector<32x8xf32> to vector<32x8xbf16>
    %c0_107 = arith.constant 0 : index
    %c0_108 = arith.constant 0 : index
    %192 = vector.load %arg18[%c0_107, %c0_108] : memref<32x32xbf16, #tpu.memory_space<vmem>>, vector<32x8xbf16>
    tpu.vector_store %arg18[%c0_107, %c0_108], %191 {strides = array<i32>} : memref<32x32xbf16, #tpu.memory_space<vmem>>, vector<32x8xbf16>,
    %193 = vector.extract_strided_slice %188 {offsets = [1, 0, 0], sizes = [1, 32, 8], strides = [1, 1, 1]} : vector<4x32x8xf32> to vector<1x32x8xf32>
    %194 = vector.shape_cast %193 : vector<1x32x8xf32> to vector<32x8xf32>
    %195 = arith.truncf %194 : vector<32x8xf32> to vector<32x8xbf16>
    %c0_109 = arith.constant 0 : index
    %c8 = arith.constant 8 : index
    %196 = vector.load %arg18[%c0_109, %c8] : memref<32x32xbf16, #tpu.memory_space<vmem>>, vector<32x8xbf16>
    tpu.vector_store %arg18[%c0_109, %c8], %195 {strides = array<i32>} : memref<32x32xbf16, #tpu.memory_space<vmem>>, vector<32x8xbf16>,
    %197 = vector.extract_strided_slice %188 {offsets = [2, 0, 0], sizes = [1, 32, 8], strides = [1, 1, 1]} : vector<4x32x8xf32> to vector<1x32x8xf32>
    %198 = vector.shape_cast %197 : vector<1x32x8xf32> to vector<32x8xf32>
    %199 = arith.truncf %198 : vector<32x8xf32> to vector<32x8xbf16>
    %c0_110 = arith.constant 0 : index
    %c16 = arith.constant 16 : index
    %200 = vector.load %arg18[%c0_110, %c16] : memref<32x32xbf16, #tpu.memory_space<vmem>>, vector<32x8xbf16>
    tpu.vector_store %arg18[%c0_110, %c16], %199 {strides = array<i32>} : memref<32x32xbf16, #tpu.memory_space<vmem>>, vector<32x8xbf16>,
    %201 = vector.extract_strided_slice %188 {offsets = [3, 0, 0], sizes = [1, 32, 8], strides = [1, 1, 1]} : vector<4x32x8xf32> to vector<1x32x8xf32>
    %202 = vector.shape_cast %201 : vector<1x32x8xf32> to vector<32x8xf32>
    %203 = arith.truncf %202 : vector<32x8xf32> to vector<32x8xbf16>
    %c0_111 = arith.constant 0 : index
    %c24 = arith.constant 24 : index
    %204 = vector.load %arg18[%c0_111, %c24] : memref<32x32xbf16, #tpu.memory_space<vmem>>, vector<32x8xbf16>
    tpu.vector_store %arg18[%c0_111, %c24], %203 {strides = array<i32>} : memref<32x32xbf16, #tpu.memory_space<vmem>>, vector<32x8xbf16>,
    %c0_112 = arith.constant 0 : index
    %c0_113 = arith.constant 0 : index
    %205 = vector.load %arg18[%c0_112, %c0_113] : memref<32x32xbf16, #tpu.memory_space<vmem>>, vector<32x32xbf16>
    %c0_114 = arith.constant 0 : index
    %c0_115 = arith.constant 0 : index
    %206 = vector.load %arg10[%c0_114, %c0_115] : memref<32x32xbf16, #tpu.memory_space<vmem>>, vector<32x32xbf16>
    %cst_116 = arith.constant dense<0.000000e+00> : vector<32x32xf32>
    %207 = tpu.matmul %205, %206, %cst_116 {dimension_numbers = #tpu.dot_dimension_numbers<[1], [0], [0], [1], [0, 0, 1, 1], [], []>} : vector<32x32xbf16>, vector<32x32xbf16>, vector<32x32xf32> -> vector<32x32xf32>
    %c0_117 = arith.constant 0 : index
    %c0_118 = arith.constant 0 : index
    %208 = vector.load %arg11[%c0_117, %c0_118] : memref<1x32xf32, #tpu.memory_space<vmem>>, vector<1x32xf32>
    %209 = vector.broadcast %208 : vector<1x32xf32> to vector<32x32xf32>
    %210 = arith.addf %207, %209 : vector<32x32xf32>
    %c0_119 = arith.constant 0 : index
    %c0_120 = arith.constant 0 : index
    %c0_121 = arith.constant 0 : index
    %211 = vector.load %arg12[%c0_119, %c0_120, %c0_121] : memref<1x32x32xf32, #tpu.memory_space<vmem>>, vector<1x32x32xf32>
    %212 = vector.shape_cast %211 : vector<1x32x32xf32> to vector<32x32xf32>
    %213 = vector.shape_cast %210 : vector<32x32xf32> to vector<1x32x32xf32>
    tpu.vector_store %arg12[%c0_119, %c0_120, %c0_121], %213 {strides = array<i32>} : memref<1x32x32xf32, #tpu.memory_space<vmem>>, vector<1x32x32xf32>,
    return
  }
  func.func @transform_0(%arg0: i32) -> (i32, i32, i32) {
    %c0_i32 = arith.constant 0 : i32
    %c0_i32_0 = arith.constant 0 : i32
    %c0_i32_1 = arith.constant 0 : i32
    return %arg0, %c0_i32, %c0_i32_0 : i32, i32, i32
  }
  func.func @transform_1(%arg0: i32) -> (i32, i32, i32) {
    %c0_i32 = arith.constant 0 : i32
    %c0_i32_0 = arith.constant 0 : i32
    %c0_i32_1 = arith.constant 0 : i32
    return %arg0, %c0_i32, %c0_i32_0 : i32, i32, i32
  }
  func.func @transform_2(%arg0: i32) -> (i32, i32, i32) {
    %c0_i32 = arith.constant 0 : i32
    %c0_i32_0 = arith.constant 0 : i32
    %c0_i32_1 = arith.constant 0 : i32
    return %arg0, %c0_i32, %c0_i32_0 : i32, i32, i32
  }
  func.func @transform_3(%arg0: i32) -> (i32, i32) {
    %c0_i32 = arith.constant 0 : i32
    %c0_i32_0 = arith.constant 0 : i32
    %c0_i32_1 = arith.constant 0 : i32
    return %c0_i32, %c0_i32_0 : i32, i32
  }
  func.func @transform_4(%arg0: i32) -> (i32, i32) {
    %c0_i32 = arith.constant 0 : i32
    %c0_i32_0 = arith.constant 0 : i32
    %c0_i32_1 = arith.constant 0 : i32
    return %c0_i32, %c0_i32_0 : i32, i32
  }
  func.func @transform_5(%arg0: i32) -> (i32, i32) {
    %c0_i32 = arith.constant 0 : i32
    %c0_i32_0 = arith.constant 0 : i32
    %c0_i32_1 = arith.constant 0 : i32
    return %c0_i32, %c0_i32_0 : i32, i32
  }
  func.func @transform_6(%arg0: i32) -> (i32, i32) {
    %c0_i32 = arith.constant 0 : i32
    %c0_i32_0 = arith.constant 0 : i32
    %c0_i32_1 = arith.constant 0 : i32
    return %c0_i32, %c0_i32_0 : i32, i32
  }
  func.func @transform_7(%arg0: i32) -> (i32, i32) {
    %c0_i32 = arith.constant 0 : i32
    %c0_i32_0 = arith.constant 0 : i32
    %c0_i32_1 = arith.constant 0 : i32
    return %c0_i32, %c0_i32_0 : i32, i32
  }
  func.func @transform_8(%arg0: i32) -> (i32, i32) {
    %c0_i32 = arith.constant 0 : i32
    %c0_i32_0 = arith.constant 0 : i32
    %c0_i32_1 = arith.constant 0 : i32
    return %c0_i32, %c0_i32_0 : i32, i32
  }
  func.func @transform_9(%arg0: i32) -> (i32, i32) {
    %c0_i32 = arith.constant 0 : i32
    %c0_i32_0 = arith.constant 0 : i32
    %c0_i32_1 = arith.constant 0 : i32
    return %c0_i32, %c0_i32_0 : i32, i32
  }
  func.func @transform_10(%arg0: i32) -> (i32, i32) {
    %c0_i32 = arith.constant 0 : i32
    %c0_i32_0 = arith.constant 0 : i32
    %c0_i32_1 = arith.constant 0 : i32
    return %c0_i32, %c0_i32_0 : i32, i32
  }
  func.func @transform_11(%arg0: i32) -> (i32, i32, i32) {
    %c0_i32 = arith.constant 0 : i32
    %c0_i32_0 = arith.constant 0 : i32
    %c0_i32_1 = arith.constant 0 : i32
    return %arg0, %c0_i32, %c0_i32_0 : i32, i32, i32
  }
  func.func @transform_12(%arg0: i32) -> (i32, i32, i32, i32) {
    %c0_i32 = arith.constant 0 : i32
    %c0_i32_0 = arith.constant 0 : i32
    %c0_i32_1 = arith.constant 0 : i32
    %c0_i32_2 = arith.constant 0 : i32
    return %arg0, %c0_i32, %c0_i32_0, %c0_i32_1 : i32, i32, i32, i32
  }
  func.func @transform_13(%arg0: i32) -> (i32, i32, i32, i32) {
    %c0_i32 = arith.constant 0 : i32
    %c0_i32_0 = arith.constant 0 : i32
    %c0_i32_1 = arith.constant 0 : i32
    %c0_i32_2 = arith.constant 0 : i32
    return %arg0, %c0_i32, %c0_i32_0, %c0_i32_1 : i32, i32, i32, i32
  }
}

</mosaic_0001>

<bundles_post_ra>
// kernel: _lambda_.1
= control target key start
LH: loop header
LB: loop body
LE: loop exit
PB: predicated region body
PF: predicated region fallthrough
CT: control target
= control target key end

     0   :  { %s4334_s0 = inlined_call_operand.vmem [shape: f32[2,32,32], index: 0, kind: input, shape index: {}]   ;;  %s4335_s1 = inlined_call_operand.hbm [shape: f32[2,32,32], index: 1, kind: input, shape index: {}]   ;;  %s4336_s2 = inlined_call_operand.hbm [shape: f32[2,32,32], index: 2, kind: input, shape index: {}]   ;;  %s4337_s3 = inlined_call_operand.vmem [shape: bf16[32,36], index: 3, kind: input, shape index: {}]   ;;  %s4338_s4 = inlined_call_operand.vmem [shape: f32[1,36], index: 4, kind: input, shape index: {}]   ;;  %s4339_s5 = inlined_call_operand.vmem [shape: bf16[32,32], index: 5, kind: input, shape index: {}]   ;;  %s4340_s6 = inlined_call_operand.vmem [shape: f32[1,32], index: 6, kind: input, shape index: {}]   ;;  %s4341_s7 = inlined_call_operand.vmem [shape: bf16[32,32], index: 7, kind: input, shape index: {}]   ;;  %s4342_s8 = inlined_call_operand.vmem [shape: f32[1,32], index: 8, kind: input, shape index: {}]   ;;  %s4343_s9 = inlined_call_operand.vmem [shape: bf16[32,32], index: 9, kind: input, shape index: {}]   ;;  %s4344_s10 = inlined_call_operand.vmem [shape: f32[1,32], index: 10, kind: input, shape index: {}]   ;;  %s4345_s11 = inlined_call_operand.hbm [shape: f32[2,32,32], index: 11, kind: output, shape index: {0}]   ;;  %s4346_s12 = inlined_call_operand.hbm [shape: f32[2,4,32,32], index: 12, kind: output, shape index: {1}]   ;;  %s4347_s13 = inlined_call_operand.hbm [shape: f32[2,4,32,32], index: 13, kind: output, shape index: {2}]  }
   0x1   :  { %4361 = sst [smem:[#allocation25_spill]] %s4335_s1 }
   0x2   :  { %4362 = sst [smem:[#allocation26_spill]] %s4344_s10 }
   0x3   :  { %4363 = sst [smem:[#allocation27_spill]] %s4345_s11 }
   0x4   :  { %4364 = sst [smem:[#allocation28_spill]] %s4346_s12 }
   0x5   :  { %4365 = sst [smem:[#allocation29_spill]] %s4347_s13 }
   0x6   :  { %19 = vsyncpa [#allocation7], 0 }
   0x7   :  { %21 = vsyncpa [#allocation7 + $0x1], 0 }
   0x8   :  { %22 = vsyncpa [#allocation10], 0 }
   0x9   :  { %24 = vsyncpa [#allocation10 + $0x1], 0 }
   0xa   :  { %25 = vsyncpa [#allocation8], 0 }
   0xb   :  { %27 = vsyncpa [#allocation8 + $0x1], 0 }
   0xc   :  { %28 = vsyncpa [#allocation13], 0 }
   0xd   :  { %30 = vsyncpa [#allocation13 + $0x1], 0  ;;  %s3284_s25 = smov 0   ;;  %s3286_s26 = smov 0  }
   0xe   :  { %s3288_s27 = smov 0   ;;  %s3290_s28 = smov 0  }
   0xf LB: > { %4366 = sst [smem:[#allocation19_spill]] %s3187_s25  ;;  %s3305_s29 = sadd.s32 4294967295, %s3199_s28   ;;  %s3199_s28 = sphi %s3290_s28, %s4412_s28   ;;  %s3195_s27 = sphi %s3288_s27, %s4414_s27   ;;  %s3191_s26 = sphi %s3286_s26, %s4416_s26   ;;  %s3187_s25 = sphi %s3284_s25, %s4415_s25  }
  0x10   : > { %4367 = sst [smem:[#allocation20_spill]] %s3195_s27  ;;  %s4348_s30 = sadd.s32 4294967294, %s3199_s28  }
  0x11   : > { %s3309_s14 = sadd.s32 1, %s3199_s28   ;;  %s69_s15 = sadd.s32 1, %s3195_s27 }
  0x12   : > { %4368 = sst [smem:[#allocation21_spill]] %s3309_s14  ;;  %s66_s16 = ssub.s32 %s3199_s28, %s3309_s14 }
  0x13   : > { %p76_p0 = scmp.ne.s32.totalorder %s3195_s27, %s3191_s26  ;;  %p67_p1 = scmp.eq.s32.totalorder %s66_s16, 0 }
  0x14   : > { %p77_p2 = scmp.eq.s32.totalorder %s3199_s28, 0  ;;  %p82_p3 = scmp.ne.s32.totalorder %s3191_s26, %s3187_s25 }
  0x15   : > { %p83_p4 = scmp.eq.s32.totalorder %s3305_s29, 0  ;;  %p300_p7 = scmp.eq.s32.totalorder %s3305_s29, 1 }
  0x16   : > { %s3321_s17 = scalar_select %p67_p1, %s3195_s27, %s69_s15  }
  0x17   : > { %p3323_p5 = por %p77_p2, %p76_p0  ;;  %p3327_p6 = por %p83_p4, %p82_p3 }
  0x18   : > { %4369 = sst [smem:[#allocation22_spill]] %s3321_s17  ;;  %p306_p8 = scmp.eq.s32.totalorder %s4348_s30, 1 }
  0x19   : > { %p2813_p10 = scmp.lt.s32.totalorder %s3199_s28, 2  ;;  %p3336_p11 = por %p300_p7, %p76_p0 }
  0x1a   : > { %p3340_p12 = por %p306_p8, %p82_p3  ;;  %s3345_s22 = sand.u32 1, %s3195_s27  }
  0x1b   : > { %s4372_s20 = scalar_select %p3336_p11, 1, 0 }
  0x1c   : > { %s4374_s21 = scalar_select %p3340_p12, 1, 0 }
  0x1d   : > { %4373 = sst [smem:[#allocation23_spill]] %s4372_s20  ;;  %s4356_s23 = sshll.u32 %s3199_s28, 5 }
  0x1e   : > { %4375 = sst [smem:[#allocation24_spill]] %s4374_s21  ;;  %s4355_s24 = sshll.u32 %s3345_s22, 5 }
  0x1f   : > { %s4376_s1 = sld [smem:[#allocation25_spill]]  ;;  %s414_s14 = scalar_lea.vmem [#allocation6], %s4355_s24 }
  0x20   : > { %s422_s25 = sshll.u32 %s414_s14, 4  ;;  %p3358_p13 = pnand %p2813_p10, %p3323_p5  ;;  %s423_s25 = int_to_ptr.vmem [resolvable:$true] %s422_s25 }
  0x21   : > { %p2551_p0 = scmp.ge.s32.totalorder %s3199_s28, 1  ;;  %p452_p1 = scmp.lt.s32.totalorder %s3199_s28, 3 }
  0x22   : > { %s411_s21 = scalar_lea.sflag [#allocation7], %s3345_s22  ;;  %p3013_p3 = pneg %p3358_p13 }
  0x25   : > { %s419_s30 = scalar_lea.hbm %s4376_s1, %s4356_s23  ;;  %s3016_s18 = scalar_lea.hbm %s4376_s1, 64 }
  0x26   : > { %s420_s17 = sshll.u32 %s419_s30, 4  ;;  %s421_s17 = int_to_ptr.hbm [resolvable:$true] %s420_s17 }
  0x27   : > { %s3009_s11 = sshra.s32 %s421_s17, 4  ;;  %s3010_s11 = int_to_ptr.hbm [resolvable:$true] %s3009_s11 }
  0x28   : > { %s3011_s15 = scalar_lea.hbm %s3010_s11, 32  ;;  %p3017_p5 = scmp.lt.s32.totalorder %s3010_s11, %s4376_s1 }
  0x29   : > { %p3012_p2 = scmp.ne.s32.totalorder %s3010_s11, %s3011_s15  ;;  %p3018_p8 = scmp.lt.s32.totalorder %s3016_s18, %s3011_s15 }
  0x2b   : > { %p3014_p4 = pnand %p3013_p3, %p3012_p2  ;;  %p3019_p10 = por %p3018_p8, %p3017_p5 }
  0x2d   : > { %p3015_p7 = pneg %p3014_p4 }
  0x2f   : > { %p3020_p9 = pnand %p3019_p10, %p3015_p7 }
  0x31   : > { %3023 = shalt.err (!%p3020_p9)
}
  0x32   : > { %s3201_s23 = smov 128   ;;  %s3202_s13 = smov 8  }
  0x33   : > { %2799 = dma.hbm_to_vmem [thread:$0]  (!%p3358_p13), %s421_s17, 512, %s423_s25, %s411_s21, %s3201_s23, %s3201_s23, %s3202_s13  }
  0x34   : > { %p3382_p2 = pnand %p2551_p0, %p452_p1  ;;  %s4379_s11 = sshll.u32 %s3199_s28, 5 }
  0x35   : > { %s441_s14 = scalar_lea.hbm %s4336_s2, %s4379_s11  ;;  %s4380_s16 = sshll.u32 %s3345_s22, 5 }
  0x36   : > { %s442_s18 = sshll.u32 %s441_s14, 4  ;;  %s436_s1 = scalar_lea.vmem [#allocation9], %s4380_s16  ;;  %s443_s18 = int_to_ptr.hbm [resolvable:$true] %s442_s18 }
  0x37   : > { %s444_s10 = sshll.u32 %s436_s1, 4  ;;  %s433_s20 = scalar_lea.sflag [#allocation10], %s3345_s22  ;;  %s445_s10 = int_to_ptr.vmem [resolvable:$true] %s444_s10 }
  0x38   : > { %s3039_s12 = sshra.s32 %s443_s18, 4  ;;  %s3046_s15 = scalar_lea.hbm %s4336_s2, 64  ;;  %s3040_s12 = int_to_ptr.hbm [resolvable:$true] %s3039_s12 }
  0x39   : > { %s3041_s25 = scalar_lea.hbm %s3040_s12, 32  ;;  %p3047_p4 = scmp.lt.s32.totalorder %s3040_s12, %s4336_s2 }
  0x3a   : > { %p3042_p9 = scmp.ne.s32.totalorder %s3040_s12, %s3041_s25  ;;  %p3048_p7 = scmp.lt.s32.totalorder %s3046_s15, %s3041_s25 }
  0x3c   : > { %p3044_p0 = pnand %p3042_p9, %p3013_p3  ;;  %p3049_p5 = por %p3048_p7, %p3047_p4 }
  0x3e   : > { %p3045_p1 = pneg %p3044_p0 }
  0x40   : > { %p3050_p8 = pnand %p3049_p5, %p3045_p1 }
  0x42   : > { %3053 = shalt.err (!%p3050_p8)
}
  0x43   : > { %2802 = dma.hbm_to_vmem [thread:$0]  (!%p3358_p13), %s443_s18, 512, %s445_s10, %s433_s20, %s3201_s23, %s3201_s23, %s3202_s13  }
  0x44   : > { %456 = sbr.rel (%p3382_p2) target bundleno = 1285 (0x505), region = 64  ;;  %s3408_s1 = sand.u32 (!%p3382_p2), 1, %s3191_s26  }
  0x45   : > { %s3411_s22 = sshll.u32 (!%p3382_p2), %s3408_s1, 5  ;;  %s459_s12 = scalar_lea.sflag (!%p3382_p2), [#allocation7], %s3408_s1 }
  0x46   : > { %s3415_s14 = scalar_lea.vmem (!%p3382_p2), [#allocation6], %s3411_s22 }
  0x49   : > { %3170 = dma.done.wait (%p3327_p6), %s459_s12, 512  }
  0x4a   : > { %3172 = vsyncadd (%p3327_p6), %s459_s12, 4294966784  ;;  %s469_s10 = scalar_lea.sflag [#allocation10], %s3408_s1  ;;  %s3423_s13 = scalar_lea.vmem [#allocation9], %s3411_s22 }
  0x4b   : > { %3174 = dma.done.wait (%p3327_p6), %s469_s10, 512  }
  0x4c   : > { %3176 = vsyncadd (%p3327_p6), %s469_s10, 4294966784  ;;  %p536_p13 = scmp.lt.s32.totalorder %s3305_s29, 1  ;;  %v2750_v0 = vld [vmem:[%s4337_s3 + $0x8] sm:$0xff]  ;;  %v2749_v2 = vld [vmem:[%s4337_s3] sm:$0xff]  ;;  %vm576_vm0 = vcmask 261120   ;;  %vm815_vm1 = vcmask 60416  }
  0x4d   : > { %v2752_v1 = vld [vmem:[%s4339_s5 + $0x8] sm:$0xff]  ;;  %v2751_v3 = vld [vmem:[%s4339_s5] sm:$0xff]  ;;  %589 = vmatpush.bf16.msra.mxu0 %v2750_v0  ;;  %v546_v6 = vld [vmem:[%s3415_s14] sm:$0xff]  ;;  %vm1360_vm2 = vcmask 64512   ;;  %s2555_s19 = sshll.u32 %s3408_s1, 7  ;;  %s3206_s11 = smov 8  }
  0x4e   : > { %s537_s27 = scalar_select %p536_p13, %s3305_s29, 1  ;;  %636 = vmatpush.bf16.msra.mxu1 %v2752_v1  ;;  %v547_v7 = vld [vmem:[%s3415_s14 + $0x8] sm:$0xff]  ;;  %v2754_v8 = vld [vmem:[%s4341_s7 + $0x8] sm:$0xff]  ;;  %v2753_v11 = vld [vmem:[%s4341_s7] sm:$0xff] }
  0x4f   : > { %v602_v10 = vpack.c.bf16 %v547_v7, %v546_v6  ;;  %683 = vmatpush.bf16.msra.mxu2 %v2754_v8  ;;  %v550_v12 = vld [vmem:[%s3423_s13] sm:$0xff]  ;;  %v551_v13 = vld [vmem:[%s3423_s13 + $0x8] sm:$0xff]  ;;  %v548_v15 = vld [vmem:[%s3415_s14 + $0x10] sm:$0xff]  ;;  %s3774_s15 = scalar_lea.vmem [#allocation12], %s2555_s19  ;;  %s3207_s30 = smov 16  }
  0x50   : > { %s2748_s20 = sshll.u32 %s537_s27, 5  ;;  %v649_v14 = vpack.c.bf16 %v551_v13, %v550_v12  ;;  %v549_v16 = vld [vmem:[%s3415_s14 + $0x18] sm:$0xff]  ;;  %v552_v21 = vld [vmem:[%s3423_s13 + $0x10] sm:$0xff]  ;;  %s3203_s14 = smov 104  }
  0x51   : > { %s540_s18 = scalar_lea.vmem %s4334_s0, %s2748_s20  ;;  %590 = vmatpush.bf16.msra.mxu0 %v2749_v2  ;;  %v603_v19 = vpack.c.bf16 %v549_v16, %v548_v15  ;;  %v553_v22 = vld [vmem:[%s3423_s13 + $0x18] sm:$0xff]  ;;  %v2877_v24 = vld [vmem:[%s4338_s4] ss:$0 sm:$0xff]  ;;  %s3204_s13 = smov 120  }
  0x52   : > { %v542_v4 = vld [vmem:[%s540_s18] sm:$0xff]  ;;  %v543_v5 = vld [vmem:[%s540_s18 + $0x8] sm:$0xff]  ;;  %637 = vmatpush.bf16.msra.mxu1 %v2751_v3  ;;  %v544_v17 = vld [vmem:[%s540_s18 + $0x10] sm:$0xff]  ;;  %v650_v23 = vpack.c.bf16 %v553_v22, %v552_v21  ;;  %s3209_s12 = smov 24   ;;  %s4176_s24 = scalar_lea.vmem [#allocation14], %s2555_s19 }
  0x53   : > { %v554_v9 = vpack.c.bf16 %v543_v5, %v542_v4  ;;  %684 = vmatpush.bf16.msra.mxu2 %v2753_v11  ;;  %v545_v18 = vld [vmem:[%s540_s18 + $0x18] sm:$0xff]  ;;  %v2878_v25 = vld [vmem:[%s4340_s6] ss:$0 sm:$0xff]  ;;  %s3205_s18 = smov 112   ;;  %s2316_s16 = sand.u32 1, %s3305_s29  }
  0x54   : > { %v555_v20 = vpack.c.bf16 %v545_v18, %v544_v17  ;;  %v2879_v56 = vld [vmem:[%s4342_s8] ss:$0 sm:$0xff]  ;;  %s2784_s25 = sshll.u32 %s3305_s29, 7  ;;  %s2351_s19 = sshll.u32 %s3774_s15, 4  ;;  %s2352_s19 = int_to_ptr.vmem [resolvable:$true] %s2351_s19 }
  0x55   : > { %2567 = vmatmul.msk.bf16.vlgmr.msra.gmra.mxu0 %vm576_vm0, %v554_v9  ;;  %2577 = vmatmul.msk.bf16.vlgmr.msra.gmra.mxu1 %vm576_vm0, %v602_v10 }
  0x56   : > { %2587 = vmatmul.msk.bf16.vlgmr.msra.gmra.mxu2 %vm576_vm0, %v649_v14 }
  0x65   : > { %2578 = vmatmul.msk.bf16.gmra.mxu1 %vm576_vm0, %v603_v19  ;;  %2568 = vmatmul.msk.bf16.gmra.mxu0 %vm576_vm0, %v555_v20 }
  0x66   : > { %2588 = vmatmul.msk.bf16.gmra.mxu2 %vm576_vm0, %v650_v23 }
  0xd2   : > { %v592_v26 = vpop.f32.mrf.mxu0  ;;  %v639_v27 = vpop.f32.mrf.mxu1 }
  0xd3   : > { %v3472_v28 = vadd.f32 %v2877_v24, %v592_v26  ;;  %v640_v29 = vadd.f32 %v2878_v25, %v639_v27 }
  0xd5   : > { %v811_v30 = vpack.c.bf16 %v3472_v28, %v3472_v28  ;;  %v820_v31 = vpack.c.bf16 %v640_v29, %v640_v29 }
  0xd7   : > { %816 = vst.msk [vmem:[#allocation2] sm:$0xf] %vm815_vm1, %v811_v30  ;;  %1205 = vrot.lane.b32.xlu1 %v820_v31, %s3203_s14  ;;  %1188 = vrot.lane.b32.xlu2 %v811_v30, %s3203_s14 }
  0xd8   : > { %824 = vst.msk [vmem:[#allocation3] sm:$0xf] %vm815_vm1, %v820_v31 }
  0xd9   : > { %v686_v57 = vpop.f32.mrf.mxu2 }
  0xda   : > { %v594_v32 = vpop.f32.mrf.mxu0  ;;  %v641_v33 = vpop.f32.mrf.mxu1  ;;  %v687_v58 = vadd.f32 %v2879_v56, %v686_v57 }
  0xdb   : > { %v3480_v34 = vadd.f32 %v2877_v24, %v594_v32  ;;  %v642_v35 = vadd.f32 %v2878_v25, %v641_v33 }
  0xdc   : > { %v3527_v59 = vpack.c.bf16 %v687_v58, %v687_v58 }
  0xdd   : > { %v812_v36 = vpack.c.bf16 %v3480_v34, %v3480_v34  ;;  %v821_v37 = vpack.c.bf16 %v642_v35, %v642_v35 }
  0xde   : > { %832 = vst.msk [vmem:[#allocation4] sm:$0xf] %vm815_vm1, %v3527_v59 }
  0xdf   : > { %817 = vst.msk [vmem:[#allocation2 + $0x4] sm:$0xf] %vm815_vm1, %v812_v36  ;;  %1207 = vrot.lane.b32.xlu1 %v821_v37, %s3203_s14 }
  0xe0   : > { %825 = vst.msk [vmem:[#allocation3 + $0x4] sm:$0xf] %vm815_vm1, %v821_v37 }
  0xe1   : > { %v688_v61 = vpop.f32.mrf.mxu2 }
  0xe2   : > { %v644_v38 = vpop.f32.mrf.mxu1  ;;  %v597_v39 = vpop.f32.mrf.mxu0  ;;  %v689_v62 = vadd.f32 %v2879_v56, %v688_v61 }
  0xe3   : > { %v645_v40 = vadd.f32 %v2878_v25, %v644_v38  ;;  %v3493_v46 = vadd.f32 %v2877_v24, %v597_v39 }
  0xe4   : > { %v3534_v63 = vpack.c.bf16 %v689_v62, %v689_v62 }
  0xe5   : > { %v822_v41 = vpack.c.bf16 %v645_v40, %v645_v40  ;;  %v813_v48 = vpack.c.bf16 %v3493_v46, %v3493_v46 }
  0xe6   : > { %v2755_v54 = vld [vmem:[#allocation2] sm:$0xff]  ;;  %833 = vst.msk [vmem:[#allocation4 + $0x4] sm:$0xf] %vm815_vm1, %v3534_v63 }
  0xe7   : > { %826 = vst.msk [vmem:[#allocation3 + $0x8] sm:$0xf] %vm815_vm1, %v822_v41  ;;  %1209 = vrot.lane.b32.xlu0 %v822_v41, %s3203_s14  ;;  %993 = vrot.lane.b32.xlu1 %v820_v31, %s3204_s13  ;;  %v2763_v52 = vld [vmem:[#allocation3] sm:$0xff] }
  0xe8   : > { %997 = vrot.lane.b32.xlu2 %v822_v41, %s3204_s13  ;;  %818 = vst.msk [vmem:[#allocation2 + $0x8] sm:$0xf] %vm815_vm1, %v813_v48  ;;  %v1368_v53 = vsel %vm1360_vm2, %v2763_v52, 0 }
  0xe9   : > { %v691_v0 = vpop.f32.mrf.mxu2 }
  0xea   : > { %v646_v42 = vpop.f32.mrf.mxu1  ;;  %v599_v43 = vpop.f32.mrf.mxu0  ;;  %v692_v1 = vadd.f32 %v2879_v56, %v691_v0 }
  0xeb   : > { %v647_v44 = vadd.f32 %v2878_v25, %v646_v42  ;;  %v3491_v45 = vadd.f32 %v2877_v24, %v599_v43 }
  0xec   : > { %v3538_v3 = vpack.c.bf16 %v692_v1, %v692_v1 }
  0xed   : > { %v823_v47 = vpack.c.bf16 %v647_v44, %v647_v44  ;;  %v814_v49 = vpack.c.bf16 %v3491_v45, %v3491_v45  ;;  %v2771_v43 = vld [vmem:[#allocation4] sm:$0xff] }
  0xee   : > { %834 = vst.msk [vmem:[#allocation4 + $0x8] sm:$0xf] %vm815_vm1, %v3538_v3 }
  0xef   : > { %827 = vst.msk [vmem:[#allocation3 + $0xc] sm:$0xf] %vm815_vm1, %v823_v47  ;;  %1105 = vrot.lane.b32.xlu0 %v822_v41, %s3205_s18  ;;  %1107 = vrot.lane.b32.xlu1 %v823_v47, %s3205_s18 }
  0xf0   : > { %999 = vrot.lane.b32.xlu2 %v823_v47, %s3204_s13  ;;  %819 = vst.msk [vmem:[#allocation2 + $0xc] sm:$0xf] %vm815_vm1, %v814_v49 }
  0xf1   : > { %v693_v4 = vpop.f32.mrf.mxu2 }
  0xf2   : > { %v694_v5 = vadd.f32 %v2879_v56, %v693_v4 }
  0xf4   : > { %v3548_v8 = vpack.c.bf16 %v694_v5, %v694_v5 }
  0xf6   : > { %v2764_v50 = vld [vmem:[#allocation3 + $0x8] sm:$0xff]  ;;  %835 = vst.msk [vmem:[#allocation4 + $0xc] sm:$0xf] %vm815_vm1, %v3548_v8 }
  0xf7   : > { %1211 = vrot.lane.b32.xlu0 %v823_v47, %s3203_s14  ;;  %1103 = vrot.lane.b32.xlu1 %v821_v37, %s3205_s18  ;;  %v1371_v51 = vsel %vm1360_vm2, %v2764_v50, 0  ;;  %v2756_v55 = vld [vmem:[#allocation2 + $0x8] sm:$0xff] }
  0xf8   : > { %995 = vrot.lane.b32.xlu2 %v821_v37, %s3204_s13  ;;  %1379 = vmatpush.bf16.xpose.msra.mxu3 %v1371_v51 }
  0xfd   : > { %v2772_v42 = vld [vmem:[#allocation4 + $0x8] sm:$0xff] }
  0xff   : > { %1190 = vrot.lane.b32.xlu0 %v812_v36, %s3203_s14  ;;  %1084 = vrot.lane.b32.xlu1 %v811_v30, %s3205_s18 }
 0x100   : > { %972 = vrot.lane.b32.xlu2 %v811_v30, %s3204_s13  ;;  %1380 = vmatpush.bf16.xpose.msra.mxu3 %v1368_v53 }
 0x107   : > { %1101 = vrot.lane.b32.xlu0 %v820_v31, %s3205_s18  ;;  %1194 = vrot.lane.b32.xlu1 %v814_v49, %s3203_s14 }
 0x108   : > { %1086 = vrot.lane.b32.xlu2 %v812_v36, %s3205_s18  ;;  %2621 = vmatmul.msk.bf16.vlgmr.msra.gmra.mxu3 %vm1360_vm2, %v2755_v54 }
 0x109   : > { %2011 = vmatpush.bf16.msrb.mxu3 %v2772_v42 }
 0x10d   : > { %2012 = vmatpush.bf16.msrb.mxu3 %v2771_v43 }
 0x10f   : > { %974 = vrot.lane.b32.xlu0 %v812_v36, %s3204_s13  ;;  %1088 = vrot.lane.b32.xlu1 %v813_v48, %s3205_s18 }
 0x110   : > { %976 = vrot.lane.b32.xlu2 %v813_v48, %s3204_s13 }
 0x117   : > { %1192 = vrot.lane.b32.xlu0 %v813_v48, %s3203_s14  ;;  %1222 = vrot.lane.b32.xlu1 %v3527_v59, %s3203_s14 }
 0x118   : > { %2622 = vmatmul.msk.bf16.gmra.mxu3 %vm1360_vm2, %v2756_v55  ;;  %1090 = vrot.lane.b32.xlu2 %v814_v49, %s3205_s18 }
 0x11f   : > { %978 = vrot.lane.b32.xlu0 %v814_v49, %s3204_s13  ;;  %1228 = vrot.lane.b32.xlu1 %v3548_v8, %s3203_s14 }
 0x120   : > { %1018 = vrot.lane.b32.xlu2 %v3538_v3, %s3204_s13 }
 0x127   : > { %1226 = vrot.lane.b32.xlu0 %v3538_v3, %s3203_s14 }
 0x12f   : > { %1020 = vrot.lane.b32.xlu0 %v3548_v8, %s3204_s13 }
 0x131   : > { %v1189_v60 = vpop.permute.xlu2 %1188 }
 0x132   : > { %1201 = vst.msk [vmem:[#allocation2 + $0x30] sm:$0xf] %vm815_vm1, %v1189_v60 }
 0x142   : > { %v998_v2 = vpop.permute.xlu2 %997 }
 0x143   : > { %1008 = vst.msk [vmem:[#allocation3 + $0x18] sm:$0xf] %vm815_vm1, %v998_v2 }
 0x149   : > { %v1206_v6 = vpop.permute.xlu1 %1205 }
 0x14a   : > { %1218 = vst.msk [vmem:[#allocation3 + $0x30] sm:$0xf] %vm815_vm1, %v1206_v6  ;;  %v1000_v7 = vpop.permute.xlu2 %999 }
 0x14b   : > { %1009 = vst.msk [vmem:[#allocation3 + $0x1c] sm:$0xf] %vm815_vm1, %v1000_v7 }
 0x151   : > { %v1208_v9 = vpop.permute.xlu1 %1207 }
 0x152   : > { %1219 = vst.msk [vmem:[#allocation3 + $0x34] sm:$0xf] %vm815_vm1, %v1208_v9  ;;  %v996_v10 = vpop.permute.xlu2 %995  ;;  %v2766_v11 = vld [vmem:[#allocation3 + $0x18] sm:$0xff] }
 0x153   : > { %1007 = vst.msk [vmem:[#allocation3 + $0x14] sm:$0xf] %vm815_vm1, %v996_v10  ;;  %v1422_v12 = vsel %vm1360_vm2, %v2766_v11, 0 }
 0x154   : > { %1430 = vmatpush.bf16.xpose.msrb.mxu0 %v1422_v12 }
 0x159   : > { %v1210_v13 = vpop.permute.xlu0 %1209  ;;  %v994_v14 = vpop.permute.xlu1 %993  ;;  %v2769_v32 = vld [vmem:[#allocation3 + $0x30] sm:$0xff] }
 0x15a   : > { %1220 = vst.msk [vmem:[#allocation3 + $0x38] sm:$0xf] %vm815_vm1, %v1210_v13  ;;  %v973_v15 = vpop.permute.xlu2 %972  ;;  %v1521_v36 = vsel %vm1360_vm2, %v2769_v32, 0 }
 0x15b   : > { %1006 = vst.msk [vmem:[#allocation3 + $0x10] sm:$0xf] %vm815_vm1, %v994_v14 }
 0x15c   : > { %985 = vst.msk [vmem:[#allocation2 + $0x10] sm:$0xf] %vm815_vm1, %v973_v15 }
 0x161   : > { %v1106_v16 = vpop.permute.xlu0 %1105  ;;  %v1108_v17 = vpop.permute.xlu1 %1107 }
 0x162   : > { %1116 = vst.msk [vmem:[#allocation3 + $0x28] sm:$0xf] %vm815_vm1, %v1106_v16  ;;  %v1087_v18 = vpop.permute.xlu2 %1086  ;;  %v2765_v19 = vld [vmem:[#allocation3 + $0x10] sm:$0xff] }
 0x163   : > { %1117 = vst.msk [vmem:[#allocation3 + $0x2c] sm:$0xf] %vm815_vm1, %v1108_v17  ;;  %v1419_v20 = vsel %vm1360_vm2, %v2765_v19, 0 }
 0x164   : > { %1098 = vst.msk [vmem:[#allocation2 + $0x24] sm:$0xf] %vm815_vm1, %v1087_v18  ;;  %1431 = vmatpush.bf16.xpose.msrb.mxu0 %v1419_v20 }
 0x169   : > { %v1212_v21 = vpop.permute.xlu0 %1211  ;;  %v1104_v22 = vpop.permute.xlu1 %1103 }
 0x16a   : > { %1221 = vst.msk [vmem:[#allocation3 + $0x3c] sm:$0xf] %vm815_vm1, %v1212_v21  ;;  %v2768_v23 = vld [vmem:[#allocation3 + $0x28] sm:$0xff]  ;;  %v977_v24 = vpop.permute.xlu2 %976 }
 0x16b   : > { %1115 = vst.msk [vmem:[#allocation3 + $0x24] sm:$0xf] %vm815_vm1, %v1104_v22  ;;  %v1473_v25 = vsel %vm1360_vm2, %v2768_v23, 0 }
 0x16c   : > { %987 = vst.msk [vmem:[#allocation2 + $0x18] sm:$0xf] %vm815_vm1, %v977_v24  ;;  %1481 = vmatpush.bf16.xpose.msrb.mxu1 %v1473_v25 }
 0x171   : > { %v1191_v26 = vpop.permute.xlu0 %1190  ;;  %v1085_v27 = vpop.permute.xlu1 %1084  ;;  %v2770_v29 = vld [vmem:[#allocation3 + $0x38] sm:$0xff] }
 0x172   : > { %1202 = vst.msk [vmem:[#allocation2 + $0x34] sm:$0xf] %vm815_vm1, %v1191_v26  ;;  %v1091_v30 = vpop.permute.xlu2 %1090  ;;  %v1524_v31 = vsel %vm1360_vm2, %v2770_v29, 0 }
 0x173   : > { %1097 = vst.msk [vmem:[#allocation2 + $0x20] sm:$0xf] %vm815_vm1, %v1085_v27  ;;  %1532 = vmatpush.bf16.xpose.msrb.mxu2 %v1524_v31 }
 0x174   : > { %1100 = vst.msk [vmem:[#allocation2 + $0x2c] sm:$0xf] %vm815_vm1, %v1091_v30 }
 0x179   : > { %v1102_v33 = vpop.permute.xlu0 %1101  ;;  %v1195_v35 = vpop.permute.xlu1 %1194  ;;  %v2761_v38 = vld [vmem:[#allocation2 + $0x30] sm:$0xff] }
 0x17a   : > { %1114 = vst.msk [vmem:[#allocation3 + $0x20] sm:$0xf] %vm815_vm1, %v1102_v33  ;;  %v2759_v48 = vld [vmem:[#allocation2 + $0x20] sm:$0xff]  ;;  %v1019_v60 = vpop.permute.xlu2 %1018 }
 0x17b   : > { %1204 = vst.msk [vmem:[#allocation2 + $0x3c] sm:$0xf] %vm815_vm1, %v1195_v35  ;;  %1533 = vmatpush.bf16.xpose.msrb.mxu2 %v1521_v36 }
 0x17c   : > { %1029 = vst.msk [vmem:[#allocation4 + $0x18] sm:$0xf] %vm815_vm1, %v1019_v60 }
 0x181   : > { %v975_v37 = vpop.permute.xlu0 %974  ;;  %v2767_v39 = vld [vmem:[#allocation3 + $0x20] sm:$0xff]  ;;  %v1089_v40 = vpop.permute.xlu1 %1088 }
 0x182   : > { %986 = vst.msk [vmem:[#allocation2 + $0x14] sm:$0xf] %vm815_vm1, %v975_v37  ;;  %2675 = vmatmul.msk.bf16.vlgmr.msrb.gmra.mxu2 %vm1360_vm2, %v2761_v38  ;;  %v1470_v41 = vsel %vm1360_vm2, %v2767_v39, 0 }
 0x183   : > { %1099 = vst.msk [vmem:[#allocation2 + $0x28] sm:$0xf] %vm815_vm1, %v1089_v40  ;;  %1482 = vmatpush.bf16.xpose.msrb.mxu1 %v1470_v41 }
 0x189   : > { %v1193_v44 = vpop.permute.xlu0 %1192  ;;  %v2757_v47 = vld [vmem:[#allocation2 + $0x10] sm:$0xff]  ;;  %v1223_v62 = vpop.permute.xlu1 %1222 }
 0x18a   : > { %1203 = vst.msk [vmem:[#allocation2 + $0x38] sm:$0xf] %vm815_vm1, %v1193_v44  ;;  %2639 = vmatmul.msk.bf16.vlgmr.msrb.gmra.mxu0 %vm1360_vm2, %v2757_v47  ;;  %2657 = vmatmul.msk.bf16.vlgmr.msrb.gmra.mxu1 %vm1360_vm2, %v2759_v48  ;;  %v2760_v56 = vld [vmem:[#allocation2 + $0x28] sm:$0xff] }
 0x18b   : > { %v3583_v49 = vpop.f32.mrf.mxu3  ;;  %1235 = vst.msk [vmem:[#allocation4 + $0x30] sm:$0xf] %vm815_vm1, %v1223_v62 }
 0x18c   : > { %v1545_v50 = vsel %vm576_vm0, %v3583_v49, -inf }
 0x18d   : > { %1546 = vmax.xlane.f32.xlu2 %v1545_v50 }
 0x191   : > { %v979_v51 = vpop.permute.xlu0 %978  ;;  %v2762_v52 = vld [vmem:[#allocation2 + $0x38] sm:$0xff]  ;;  %v1229_v4 = vpop.permute.xlu1 %1228 }
 0x192   : > { %988 = vst.msk [vmem:[#allocation2 + $0x1c] sm:$0xf] %vm815_vm1, %v979_v51  ;;  %2676 = vmatmul.msk.bf16.gmra.mxu2 %vm1360_vm2, %v2762_v52 }
 0x193   : > { %v3590_v53 = vpop.f32.mrf.mxu3  ;;  %1238 = vst.msk [vmem:[#allocation4 + $0x3c] sm:$0xf] %vm815_vm1, %v1229_v4 }
 0x194   : > { %v1548_v54 = vsel %vm576_vm0, %v3590_v53, -inf }
 0x195   : > { %1549 = vmax.xlane.f32.xlu0 %v1548_v54 }
 0x199   : > { %v2758_v55 = vld [vmem:[#allocation2 + $0x18] sm:$0xff]  ;;  %v1227_v1 = vpop.permute.xlu0 %1226 }
 0x19a   : > { %2640 = vmatmul.msk.bf16.gmra.mxu0 %vm1360_vm2, %v2758_v55  ;;  %2658 = vmatmul.msk.bf16.gmra.mxu1 %vm1360_vm2, %v2760_v56  ;;  %1237 = vst.msk [vmem:[#allocation4 + $0x38] sm:$0xf] %vm815_vm1, %v1227_v1 }
 0x19b   : > { %v3595_v57 = vpop.f32.mrf.mxu3 }
 0x19c   : > { %v1551_v58 = vsel %vm576_vm0, %v3595_v57, -inf }
 0x19d   : > { %1552 = vmax.xlane.f32.xlu1 %v1551_v58 }
 0x1a1   : > { %v1021_v2 = vpop.permute.xlu0 %1020  ;;  %v2778_v32 = vld [vmem:[#allocation4 + $0x38] sm:$0xff] }
 0x1a2   : > { %1030 = vst.msk [vmem:[#allocation4 + $0x1c] sm:$0xf] %vm815_vm1, %v1021_v2  ;;  %2152 = vmatpush.bf16.msra.mxu2 %v2778_v32 }
 0x1a3   : > { %v3602_v61 = vpop.f32.mrf.mxu3 }
 0x1a4   : > { %v1554_v0 = vsel %vm576_vm0, %v3602_v61, -inf }
 0x1a5   : > { %1555 = vmax.xlane.f32.xlu2 %v1554_v0 }
 0x1a9   : > { %v2774_v23 = vld [vmem:[#allocation4 + $0x18] sm:$0xff] }
 0x1aa   : > { %2058 = vmatpush.bf16.msra.mxu0 %v2774_v23 }
 0x200   : > { %v3661_v33 = vpop.xlane.xlu2 %1546 }
 0x205   : > { %v3610_v5 = vpop.f32.mrf.mxu2 }
 0x206   : > { %v1581_v14 = vsel %vm576_vm0, %v3610_v5, -inf }
 0x207   : > { %v1433_v6 = vpop.f32.mrf.mxu0  ;;  %v1484_v7 = vpop.f32.mrf.mxu1 }
 0x208   : > { %v1569_v9 = vsel %vm576_vm0, %v1484_v7, -inf  ;;  %v1557_v10 = vsel %vm576_vm0, %v1433_v6, -inf  ;;  %v3663_v35 = vpop.xlane.xlu0 %1549 }
 0x209   : > { %1570 = vmax.xlane.f32.xlu0 %v1569_v9  ;;  %1558 = vmax.xlane.f32.xlu2 %v1557_v10 }
 0x20d   : > { %v3614_v11 = vpop.f32.mrf.mxu2 }
 0x20e   : > { %v1584_v22 = vsel %vm576_vm0, %v3614_v11, -inf }
 0x20f   : > { %v3616_v12 = vpop.f32.mrf.mxu0  ;;  %v1486_v13 = vpop.f32.mrf.mxu1 }
 0x210   : > { %v1572_v15 = vsel %vm576_vm0, %v1486_v13, -inf  ;;  %v1560_v16 = vsel %vm576_vm0, %v3616_v12, -inf  ;;  %v3667_v37 = vpop.xlane.xlu1 %1552 }
 0x211   : > { %1582 = vmax.xlane.f32.xlu0 %v1581_v14  ;;  %1573 = vmax.xlane.f32.xlu1 %v1572_v15 }
 0x212   : > { %1561 = vmax.xlane.f32.xlu2 %v1560_v16 }
 0x215   : > { %v3623_v17 = vpop.f32.mrf.mxu2 }
 0x216   : > { %v1587_v20 = vsel %vm576_vm0, %v3623_v17, -inf }
 0x217   : > { %v3625_v18 = vpop.f32.mrf.mxu0  ;;  %v3627_v19 = vpop.f32.mrf.mxu1 }
 0x218   : > { %v1575_v21 = vsel %vm576_vm0, %v3627_v19, -inf  ;;  %v1563_v27 = vsel %vm576_vm0, %v3625_v18, -inf  ;;  %v3665_v36 = vpop.xlane.xlu2 %1555 }
 0x219   : > { %1576 = vmax.xlane.f32.xlu0 %v1575_v21  ;;  %1585 = vmax.xlane.f32.xlu1 %v1584_v22 }
 0x21a   : > { %1588 = vmax.xlane.f32.xlu2 %v1587_v20 }
 0x21d   : > { %v3635_v24 = vpop.f32.mrf.mxu2 }
 0x21e   : > { %v1590_v25 = vsel %vm576_vm0, %v3635_v24, -inf }
 0x21f   : > { %v3639_v26 = vpop.f32.mrf.mxu0  ;;  %v3645_v30 = vpop.f32.mrf.mxu1 }
 0x220   : > { %v1566_v29 = vsel %vm576_vm0, %v3639_v26, -inf  ;;  %v1578_v31 = vsel %vm576_vm0, %v3645_v30, -inf }
 0x221   : > { %1591 = vmax.xlane.f32.xlu0 %v1590_v25  ;;  %1564 = vmax.xlane.f32.xlu1 %v1563_v27 }
 0x222   : > { %1567 = vmax.xlane.f32.xlu2 %v1566_v29 }
 0x229   : > { %1579 = vmax.xlane.f32.xlu1 %v1578_v31 }
 0x235   : > { %1224 = vrot.lane.b32.xlu0 %v3534_v63, %s3203_s14 }
 0x23a   : > { %1122 = vrot.lane.b32.xlu2 %v3538_v3, %s3205_s18 }
 0x242   : > { %1124 = vrot.lane.b32.xlu1 %v3548_v8, %s3205_s18 }
 0x24a   : > { %1014 = vrot.lane.b32.xlu1 %v3527_v59, %s3204_s13 }
 0x252   : > { %1016 = vrot.lane.b32.xlu1 %v3534_v63, %s3204_s13 }
 0x25a   : > { %1118 = vrot.lane.b32.xlu1 %v3527_v59, %s3205_s18 }
 0x27c   : > { %v1571_v3 = vpop.xlane.xlu0 %1570  ;;  %v1559_v38 = vpop.xlane.xlu2 %1558 }
 0x27d   : > { %v1601_v8 = vsub.f32 %v1484_v7, %v1571_v3  ;;  %v1597_v39 = vsub.f32 %v1433_v6, %v1559_v38 }
 0x27f   : > { %v1625_v40 = vmul.f32 1.442695, %v1601_v8  ;;  %v1617_v41 = vmul.f32 1.442695, %v1597_v39 }
 0x281   : > { %2881 = vpow2.f32 %v1625_v40 }
 0x282   : > { %2883 = vpow2.f32 %v1617_v41 }
 0x284   : > { %v1583_v42 = vpop.xlane.xlu0 %1582  ;;  %v1574_v43 = vpop.xlane.xlu1 %1573 }
 0x285   : > { %v1605_v59 = vsub.f32 %v3610_v5, %v1583_v42  ;;  %v1602_v44 = vsub.f32 %v1486_v13, %v1574_v43  ;;  %v1562_v47 = vpop.xlane.xlu2 %1561 }
 0x286   : > { %v1598_v52 = vsub.f32 %v3616_v12, %v1562_v47 }
 0x287   : > { %v3670_v48 = vpop.eup %2881  ;;  %v1633_v50 = vmul.f32 1.442695, %v1605_v59  ;;  %v1627_v51 = vmul.f32 1.442695, %v1602_v44 }
 0x288   : > { %v3673_v54 = vpop.eup %2883  ;;  %v1665_v55 = vsel %vm576_vm0, %v3670_v48, 0.0  ;;  %v1619_v58 = vmul.f32 1.442695, %v1598_v52 }
 0x289   : > { %2885 = vpow2.f32 %v1633_v50  ;;  %1666 = vadd.xlane.f32.xlu1 %v1665_v55  ;;  %v1653_v56 = vsel %vm576_vm0, %v3673_v54, 0.0 }
 0x28a   : > { %2887 = vpow2.f32 %v1627_v51  ;;  %1654 = vadd.xlane.f32.xlu2 %v1653_v56 }
 0x28b   : > { %2889 = vpow2.f32 %v1619_v58 }
 0x28c   : > { %v1577_v60 = vpop.xlane.xlu0 %1576  ;;  %v1586_v62 = vpop.xlane.xlu1 %1585 }
 0x28d   : > { %v1606_v0 = vsub.f32 %v3614_v11, %v1586_v62  ;;  %v1589_v1 = vpop.xlane.xlu2 %1588  ;;  %v1603_v16 = vsub.f32 %v3627_v19, %v1577_v60 }
 0x28e   : > { %v1607_v5 = vsub.f32 %v3623_v17, %v1589_v1 }
 0x28f   : > { %v3680_v2 = vpop.eup %2885  ;;  %v1635_v4 = vmul.f32 1.442695, %v1606_v0  ;;  %v1629_v25 = vmul.f32 1.442695, %v1603_v16 }
 0x290   : > { %v3683_v6 = vpop.eup %2887  ;;  %v1677_v7 = vsel %vm576_vm0, %v3680_v2, 0.0  ;;  %v1637_v10 = vmul.f32 1.442695, %v1607_v5 }
 0x291   : > { %1678 = vadd.xlane.f32.xlu0 %v1677_v7  ;;  %v1668_v9 = vsel %vm576_vm0, %v3683_v6, 0.0  ;;  %2891 = vpow2.f32 %v1635_v4  ;;  %v3691_v13 = vpop.eup %2889 }
 0x292   : > { %1669 = vadd.xlane.f32.xlu2 %v1668_v9  ;;  %2893 = vpow2.f32 %v1637_v10  ;;  %v1656_v22 = vsel %vm576_vm0, %v3691_v13, 0.0 }
 0x294   : > { %v1592_v11 = vpop.xlane.xlu0 %1591  ;;  %v3689_v12 = vpop.xlane.xlu1 %1564 }
 0x295   : > { %v1608_v14 = vsub.f32 %v3635_v24, %v1592_v11  ;;  %v1568_v15 = vpop.xlane.xlu2 %1567  ;;  %v1599_v1 = vsub.f32 %v3625_v18, %v3689_v12 }
 0x296   : > { %v1600_v20 = vsub.f32 %v3639_v26, %v1568_v15  ;;  %v1593_v26 = vsub.f32 %v3583_v49, %v3661_v33  ;;  %v1594_v33 = vsub.f32 %v3590_v53, %v3663_v35 }
 0x297   : > { %v1639_v17 = vmul.f32 1.442695, %v1608_v14  ;;  %v3696_v21 = vpop.eup %2891  ;;  %v1621_v7 = vmul.f32 1.442695, %v1599_v1 }
 0x298   : > { %v1680_v23 = vsel %vm576_vm0, %v3696_v21, 0.0  ;;  %v1623_v24 = vmul.f32 1.442695, %v1600_v20  ;;  %v3702_v29 = vpop.eup %2893  ;;  %v1609_v8 = vmul.f32 1.442695, %v1593_v26 }
 0x299   : > { %2895 = vpow2.f32 %v1639_v17  ;;  %1657 = vadd.xlane.f32.xlu0 %v1656_v22  ;;  %1681 = vadd.xlane.f32.xlu1 %v1680_v23  ;;  %v1683_v38 = vsel %vm576_vm0, %v3702_v29, 0.0  ;;  %v1611_v59 = vmul.f32 1.442695, %v1594_v33 }
 0x29a   : > { %2897 = vpow2.f32 %v1629_v25 }
 0x29b   : > { %2899 = vpow2.f32 %v1623_v24 }
 0x29c   : > { %v1580_v27 = vpop.xlane.xlu1 %1579  ;;  %2901 = vpow2.f32 %v1609_v8 }
 0x29d   : > { %v1123_v19 = vpop.permute.xlu2 %1122  ;;  %v1604_v32 = vsub.f32 %v3645_v30, %v1580_v27  ;;  %v1595_v30 = vsub.f32 %v3595_v57, %v3667_v37  ;;  %v1596_v57 = vsub.f32 %v3602_v61, %v3665_v36 }
 0x29e   : > { %1133 = vst.msk [vmem:[#allocation4 + $0x28] sm:$0xf] %vm815_vm1, %v1123_v19 }
 0x29f   : > { %v3707_v31 = vpop.eup %2895  ;;  %v1631_v39 = vmul.f32 1.442695, %v1604_v32  ;;  %v1613_v44 = vmul.f32 1.442695, %v1595_v30  ;;  %v1615_v51 = vmul.f32 1.442695, %v1596_v57 }
 0x2a0   : > { %v1686_v3 = vsel %vm576_vm0, %v3707_v31, 0.0  ;;  %v3714_v40 = vpop.eup %2897 }
 0x2a1   : > { %1687 = vadd.xlane.f32.xlu2 %v1686_v3  ;;  %1684 = vadd.xlane.f32.xlu0 %v1683_v38  ;;  %v3716_v49 = vpop.eup %2899  ;;  %2903 = vpow2.f32 %v1631_v39  ;;  %v1671_v42 = vsel %vm576_vm0, %v3714_v40, 0.0 }
 0x2a2   : > { %v1662_v43 = vsel %vm576_vm0, %v3716_v49, 0.0  ;;  %v3727_v47 = vpop.eup %2901  ;;  %2905 = vpow2.f32 %v1611_v59 }
 0x2a3   : > { %2907 = vpow2.f32 %v1613_v44  ;;  %v1641_v37 = vsel %vm576_vm0, %v3727_v47, 0.0 }
 0x2a4   : > { %2909 = vpow2.f32 %v1615_v51 }
 0x2a5   : > { %2911 = vpow2.f32 %v1621_v7 }
 0x2a7   : > { %v1225_v41 = vpop.permute.xlu0 %1224  ;;  %v3729_v53 = vpop.eup %2903 }
 0x2a8   : > { %1236 = vst.msk [vmem:[#allocation4 + $0x34] sm:$0xf] %vm815_vm1, %v1225_v41  ;;  %v1674_v50 = vsel %vm576_vm0, %v3729_v53, 0.0  ;;  %v3739_v52 = vpop.eup %2905 }
 0x2a9   : > { %1672 = vadd.xlane.f32.xlu2 %v1671_v42  ;;  %1663 = vadd.xlane.f32.xlu0 %v1662_v43  ;;  %v3741_v56 = vpop.eup %2907  ;;  %v1644_v36 = vsel %vm576_vm0, %v3739_v52, 0.0 }
 0x2aa   : > { %v1647_v61 = vsel %vm576_vm0, %v3741_v56, 0.0  ;;  %v3748_v62 = vpop.eup %2909 }
 0x2ab   : > { %v3757_v9 = vpop.eup %2911 }
 0x2ac   : > { %v1659_v10 = vsel %vm576_vm0, %v3757_v9, 0.0 }
 0x2af   : > { %v2777_v35 = vld [vmem:[#allocation4 + $0x30] sm:$0xff] }
 0x2b0   : > { %2153 = vmatpush.bf16.msra.mxu2 %v2777_v35 }
 0x2b1   : > { %1642 = vadd.xlane.f32.xlu2 %v1641_v37  ;;  %1675 = vadd.xlane.f32.xlu0 %v1674_v50 }
 0x2b2   : > { %1120 = vrot.lane.b32.xlu1 %v3534_v63, %s3205_s18  ;;  %v1650_v63 = vsel %vm576_vm0, %v3748_v62, 0.0  ;;  %s4403_s18 = sld [smem:[#allocation28_spill]] }
 0x2b4   : > { %v1125_v55 = vpop.permute.xlu1 %1124 }
 0x2b5   : > { %1134 = vst.msk [vmem:[#allocation4 + $0x2c] sm:$0xf] %vm815_vm1, %v1125_v55 }
 0x2b8   : > { %s2350_s21 = scalar_lea.hbm %s4403_s18, %s2784_s25  ;;  %s3089_s23 = scalar_lea.hbm %s4403_s18, 256 }
 0x2b9   : > { %1648 = vadd.xlane.f32.xlu2 %v1647_v61  ;;  %1645 = vadd.xlane.f32.xlu0 %v1644_v36 }
 0x2bc   : > { %v1015_v58 = vpop.permute.xlu1 %1014  ;;  %v2776_v60 = vld [vmem:[#allocation4 + $0x28] sm:$0xff] }
 0x2bd   : > { %1027 = vst.msk [vmem:[#allocation4 + $0x10] sm:$0xf] %vm815_vm1, %v1015_v58  ;;  %2105 = vmatpush.bf16.msra.mxu1 %v2776_v60 }
 0x2c1   : > { %1651 = vadd.xlane.f32.xlu0 %v1650_v63 }
 0x2c4   : > { %v1017_v0 = vpop.permute.xlu1 %1016 }
 0x2c5   : > { %1028 = vst.msk [vmem:[#allocation4 + $0x14] sm:$0xf] %vm815_vm1, %v1017_v0 }
 0x2cc   : > { %v1119_v4 = vpop.permute.xlu1 %1118  ;;  %v2773_v5 = vld [vmem:[#allocation4 + $0x10] sm:$0xff] }
 0x2cd   : > { %1131 = vst.msk [vmem:[#allocation4 + $0x20] sm:$0xf] %vm815_vm1, %v1119_v4  ;;  %2059 = vmatpush.bf16.msra.mxu0 %v2773_v5 }
 0x2dc   : > { %1660 = vadd.xlane.f32.xlu1 %v1659_v10 }
 0x2fc   : > { %v1667_v11 = vpop.xlane.xlu1 %1666 }
 0x2fd   : > { %2913 = vrcp.f32 %v1667_v11  ;;  %v1655_v14 = vpop.xlane.xlu2 %1654  ;;  %v1820_v23 = vand.u32 2147483648, %v1667_v11  ;;  %v1818_v27 = vand.u32 2147483647, %v1667_v11  ;;  %vm1814_vm5 = vweird.f32 %v1667_v11 }
 0x2fe   : > { %2915 = vrcp.f32 %v1655_v14  ;;  %v1760_v19 = vand.u32 2147483648, %v1655_v14  ;;  %v1758_v32 = vand.u32 2147483647, %v1655_v14  ;;  %vm1754_vm7 = vweird.f32 %v1655_v14 }
 0x2ff   : > { %v1821_v8 = vor.u32 1.1754944e-38, %v1820_v23  ;;  %vm1819_vm8 = vcmp.eq.f32.partialorder %v1818_v27, 8.507059e+37 }
 0x300   : > { %v1761_v41 = vor.u32 1.1754944e-38, %v1760_v19  ;;  %vm1759_vm10 = vcmp.eq.f32.partialorder %v1758_v32, 8.507059e+37 }
 0x303   : > { %v2914_v15 = vpop.eup %2913 }
 0x304   : > { %v2916_v16 = vpop.eup %2915  ;;  %v1810_v18 = vmul.f32 %v2914_v15, %v1667_v11  ;;  %v1679_v12 = vpop.xlane.xlu0 %1678  ;;  %vm1815_vm3 = vweird.f32 %v2914_v15 }
 0x305   : > { %v1750_v17 = vmul.f32 %v2916_v16, %v1655_v14  ;;  %2917 = vrcp.f32 %v1679_v12  ;;  %v3761_v20 = vpop.xlane.xlu2 %1669  ;;  %vm1755_vm4 = vweird.f32 %v2916_v16  ;;  %vm1816_vm6 = vmor %vm1814_vm5, %vm1815_vm3  ;;  %v1878_v61 = vand.u32 2147483647, %v1679_v12 }
 0x306   : > { %v1811_v22 = vsub.f32 1.0, %v1810_v18  ;;  %2919 = vrcp.f32 %v3761_v20  ;;  %vm1756_vm9 = vmor %vm1754_vm7, %vm1755_vm4  ;;  %v1880_v36 = vand.u32 2147483648, %v1679_v12  ;;  %v1833_v63 = vand.u32 2147483647, %v3761_v20 }
 0x307   : > { %v1751_v25 = vsub.f32 1.0, %v1750_v17  ;;  %vm1874_vm13 = vweird.f32 %v1679_v12  ;;  %vm1829_vm15 = vweird.f32 %v3761_v20  ;;  %vm1879_vm2 = vcmp.eq.f32.partialorder %v1878_v61, 8.507059e+37 }
 0x308   : > { %v1812_v24 = vmul.f32 %v2914_v15, %v1811_v22  ;;  %v1881_v1 = vor.u32 1.1754944e-38, %v1880_v36  ;;  %vm1834_vm4 = vcmp.eq.f32.partialorder %v1833_v63, 8.507059e+37 }
 0x309   : > { %v1752_v26 = vmul.f32 %v2916_v16, %v1751_v25 }
 0x30a   : > { %v1813_v3 = vadd.f32 %v2914_v15, %v1812_v24 }
 0x30b   : > { %v2918_v38 = vpop.eup %2917  ;;  %v1753_v39 = vadd.f32 %v2916_v16, %v1752_v26 }
 0x30c   : > { %v2920_v33 = vpop.eup %2919  ;;  %v1817_v30 = vsel %vm1816_vm6, %v2914_v15, %v1813_v3  ;;  %v1870_v42 = vmul.f32 %v2918_v38, %v1679_v12  ;;  %v3765_v43 = vpop.xlane.xlu0 %1657  ;;  %vm1875_vm11 = vweird.f32 %v2918_v38 }
 0x30d   : > { %v1822_v59 = vsel %vm1819_vm8, %v1821_v8, %v1817_v30  ;;  %v1757_v44 = vsel %vm1756_vm9, %v2916_v16, %v1753_v39  ;;  %v1825_v57 = vmul.f32 %v2920_v33, %v3761_v20  ;;  %v1682_v35 = vpop.xlane.xlu1 %1681  ;;  %vm1830_vm12 = vweird.f32 %v2920_v33  ;;  %vm1876_vm14 = vmor %vm1874_vm13, %vm1875_vm11 }
 0x30e   : > { %v3769_v37 = vmul.f32 %v3670_v48, %v1822_v59  ;;  %v1762_v50 = vsel %vm1759_vm10, %v1761_v41, %v1757_v44  ;;  %v1871_v51 = vsub.f32 1.0, %v1870_v42  ;;  %2921 = vrcp.f32 %v1682_v35  ;;  %vm1831_vm3 = vmor %vm1829_vm15, %vm1830_vm12 }
 0x30f   : > { %v1933_v55 = vmul.f32 %v3673_v54, %v1762_v50  ;;  %v1826_v58 = vsub.f32 1.0, %v1825_v57  ;;  %v1835_v48 = vand.u32 2147483648, %v3761_v20  ;;  %2923 = vrcp.f32 %v3765_v43 }
 0x310   : > { %1953 = vst.msk [vmem:[%s3774_s15 + $0x40] sm:$0xff] %vm576_vm0, %v3769_v37  ;;  %v1872_v60 = vmul.f32 %v2918_v38, %v1871_v51  ;;  %v1893_v27 = vand.u32 2147483647, %v1682_v35  ;;  %v1895_v19 = vand.u32 2147483648, %v1682_v35  ;;  %vm1889_vm6 = vweird.f32 %v1682_v35 }
 0x311   : > { %1949 = vst.msk [vmem:[%s3774_s15 + $0x20] sm:$0xff] %vm576_vm0, %v1933_v55  ;;  %v1827_v54 = vmul.f32 %v2920_v33, %v1826_v58  ;;  %v1836_v10 = vor.u32 1.1754944e-38, %v1835_v48  ;;  %v1965_v24 = vpack.c.bf16 %v1933_v55, %v1933_v55  ;;  %v1775_v32 = vand.u32 2147483648, %v3765_v43 }
 0x312   : > { %v1873_v0 = vadd.f32 %v2918_v38, %v1872_v60  ;;  %v1969_v3 = vpack.c.bf16 %v3769_v37, %v3769_v37  ;;  %vm1894_vm9 = vcmp.eq.f32.partialorder %v1893_v27, 8.507059e+37  ;;  %vm1769_vm10 = vweird.f32 %v3765_v43 }
 0x313   : > { %v1828_v4 = vadd.f32 %v2920_v33, %v1827_v54  ;;  %v3815_v42 = vunpack.c.l.b16 %v1965_v24  ;;  %v1776_v50 = vor.u32 1.1754944e-38, %v1775_v32 }
 0x314   : > { %v2922_v5 = vpop.eup %2921  ;;  %v1877_v7 = vsel %vm1876_vm14, %v2918_v38, %v1873_v0  ;;  %v3785_v11 = vpop.xlane.xlu0 %1684  ;;  %v3830_v54 = vunpack.c.l.b16 %v1969_v3 }
 0x315   : > { %v3787_v14 = vpop.xlane.xlu2 %1687  ;;  %v1882_v15 = vsel %vm1879_vm2, %v1881_v1, %v1877_v7  ;;  %v1832_v16 = vsel %vm1831_vm3, %v2920_v33, %v1828_v4  ;;  %v1885_v18 = vmul.f32 %v2922_v5, %v1682_v35  ;;  %v2924_v12 = vpop.eup %2923  ;;  %2925 = vrcp.f32 %v3785_v11 }
 0x316   : > { %v3790_v17 = vmul.f32 %v3680_v2, %v1882_v15  ;;  %v1837_v20 = vsel %vm1834_vm4, %v1836_v10, %v1832_v16  ;;  %v1765_v25 = vmul.f32 %v2924_v12, %v3765_v43  ;;  %2927 = vrcp.f32 %v3787_v14 }
 0x317   : > { %v3794_v22 = vmul.f32 %v3683_v6, %v1837_v20  ;;  %v1886_v23 = vsub.f32 1.0, %v1885_v18  ;;  %vm1890_vm5 = vweird.f32 %v2922_v5  ;;  %v1773_v6 = vand.u32 2147483647, %v3765_v43 }
 0x318   : > { %1957 = vst.msk [vmem:[%s3774_s15 + $0x60] sm:$0xff] %vm576_vm0, %v3790_v17  ;;  %v1766_v26 = vsub.f32 1.0, %v1765_v25  ;;  %vm1770_vm7 = vweird.f32 %v2924_v12  ;;  %vm1891_vm8 = vmor %vm1889_vm6, %vm1890_vm5  ;;  %v1896_v33 = vor.u32 1.1754944e-38, %v1895_v19  ;;  %v1908_v43 = vand.u32 2147483647, %v3785_v11 }
 0x319   : > { %1954 = vst.msk [vmem:[%s3774_s15 + $0x48] sm:$0xff] %vm576_vm0, %v3794_v22  ;;  %v1887_v2 = vmul.f32 %v2922_v5, %v1886_v23  ;;  %vm1774_vm11 = vcmp.eq.f32.partialorder %v1773_v6, 8.507059e+37  ;;  %vm1771_vm12 = vmor %vm1769_vm10, %vm1770_vm7  ;;  %v1973_v58 = vpack.c.bf16 %v3790_v17, %v3790_v17  ;;  %v1910_v48 = vand.u32 2147483648, %v3785_v11 }
 0x31a   : > { %v1767_v8 = vmul.f32 %v2924_v12, %v1766_v26  ;;  %v1970_v63 = vpack.c.bf16 %v3794_v22, %v3794_v22  ;;  %v1923_v1 = vand.u32 2147483647, %v3787_v14  ;;  %vm1904_vm13 = vweird.f32 %v3785_v11 }
 0x31b   : > { %v1888_v38 = vadd.f32 %v2922_v5, %v1887_v2  ;;  %v3808_v39 = vpop.eup %2925  ;;  %vm3843_vm14 = vcmp.eq.f32.partialorder %v1908_v43, 8.507059e+37  ;;  %vm1919_vm15 = vweird.f32 %v3787_v14  ;;  %v1911_v18 = vor.u32 1.1754944e-38, %v1910_v48 }
 0x31c   : > { %v3811_v30 = vpop.xlane.xlu0 %1663  ;;  %v1768_v44 = vadd.f32 %v2924_v12, %v1767_v8  ;;  %v1900_v57 = vmul.f32 %v3808_v39, %v3785_v11  ;;  %v3819_v35 = vpop.eup %2927  ;;  %v2122_v22 = vunpack.c.l.b16 %v1973_v58  ;;  %vm1905_vm2 = vweird.f32 %v3808_v39 }
 0x31d   : > { %v3813_v41 = vpop.xlane.xlu2 %1672  ;;  %v1892_v59 = vsel %vm1891_vm8, %v2922_v5, %v1888_v38  ;;  %2929 = vrcp.f32 %v3811_v30  ;;  %v1915_v36 = vmul.f32 %v3819_v35, %v3787_v14  ;;  %vm3858_vm3 = vcmp.eq.f32.partialorder %v1923_v1, 8.507059e+37  ;;  %vm1906_vm5 = vmor %vm1904_vm13, %vm1905_vm2 }
 0x31e   : > { %v1897_v37 = vsel %vm1894_vm9, %v1896_v33, %v1892_v59  ;;  %v1772_v55 = vsel %vm1771_vm12, %v2924_v12, %v1768_v44  ;;  %v1901_v61 = vsub.f32 1.0, %v1900_v57  ;;  %2931 = vrcp.f32 %v3813_v41 }
 0x31f   : > { %v1942_v51 = vmul.f32 %v3696_v21, %v1897_v37  ;;  %v1777_v60 = vsel %vm1774_vm11, %v1776_v50, %v1772_v55  ;;  %v1916_v0 = vsub.f32 1.0, %v1915_v36  ;;  %v1805_v12 = vand.u32 2147483648, %v3811_v30 }
 0x320   : > { %v1934_v21 = vmul.f32 %v3691_v13, %v1777_v60  ;;  %v1902_v5 = vmul.f32 %v3808_v39, %v1901_v61  ;;  %v1925_v13 = vand.u32 2147483648, %v3787_v14  ;;  %v3864_v27 = vunpack.c.l.b16 %v1970_v63 }
 0x321   : > { %1958 = vst.msk [vmem:[%s3774_s15 + $0x68] sm:$0xff] %vm576_vm0, %v1942_v51  ;;  %v1974_v4 = vpack.c.bf16 %v1942_v51, %v1942_v51  ;;  %v1917_v10 = vmul.f32 %v3819_v35, %v1916_v0  ;;  %v1850_v2 = vand.u32 2147483648, %v3813_v41  ;;  %vm1920_vm4 = vweird.f32 %v3819_v35 }
 0x322   : > { %1950 = vst.msk [vmem:[%s3774_s15 + $0x28] sm:$0xff] %vm576_vm0, %v1934_v21  ;;  %v1966_v16 = vpack.c.bf16 %v1934_v21, %v1934_v21  ;;  %v1903_v19 = vadd.f32 %v3808_v39, %v1902_v5  ;;  %v1926_v32 = vor.u32 1.1754944e-38, %v1925_v13  ;;  %v1803_v38 = vand.u32 2147483647, %v3811_v30  ;;  %vm3890_vm7 = vmor %vm1919_vm15, %vm1920_vm4 }
 0x323   : > { %v3850_v15 = vpop.eup %2929  ;;  %v2123_v26 = vunpack.c.l.b16 %v1974_v4  ;;  %v1918_v6 = vadd.f32 %v3819_v35, %v1917_v10  ;;  %v3876_v8 = vor.u32 1.1754944e-38, %v1805_v12  ;;  %v1848_v33 = vand.u32 2147483647, %v3813_v41 }
 0x324   : > { %v3853_v17 = vpop.xlane.xlu0 %1675  ;;  %v1795_v25 = vmul.f32 %v3850_v15, %v3811_v30  ;;  %v1121_v24 = vpop.permute.xlu1 %1120  ;;  %v2029_v59 = vunpack.c.l.b16 %v1966_v16  ;;  %vm1844_vm6 = vweird.f32 %v3813_v41  ;;  %v2079_v37 = vpack.c.b16 %v3864_v27, %v3830_v54 }
 0x325   : > { %v3855_v20 = vpop.xlane.xlu2 %1642  ;;  %1132 = vst.msk [vmem:[#allocation4 + $0x24] sm:$0xf] %vm815_vm1, %v1121_v24  ;;  %2933 = vrcp.f32 %v3853_v17  ;;  %v3873_v3 = vpop.eup %2931  ;;  %v3894_v43 = vor.u32 1.1754944e-38, %v1850_v2  ;;  %v2126_v51 = vpack.c.b16 %v2123_v26, %v2122_v22  ;;  %v1907_v55 = vsel %vm1906_vm5, %v3808_v39, %v1903_v19 }
 0x326   : > { %2935 = vrcp.f32 %v3855_v20  ;;  %v1796_v44 = vsub.f32 1.0, %v1795_v25  ;;  %v1840_v57 = vmul.f32 %v3873_v3, %v3813_v41  ;;  %v2032_v11 = vpack.c.b16 %v2029_v59, %v3815_v42 }
 0x327   : > { %v1863_v36 = vand.u32 2147483647, %v3853_v17  ;;  %v1912_v58 = vsel %vm3843_vm14, %v1911_v18, %v1907_v55  ;;  %v1922_v14 = vsel %vm3890_vm7, %v3819_v35, %v1918_v6  ;;  %vm3906_vm8 = vcmp.eq.f32.partialorder %v1848_v33, 8.507059e+37  ;;  %2715 = vmatmul.msk.bf16.vlgmr.msra.gmra.mxu2 %vm576_vm0, %v2126_v51 }
 0x328   : > { %v1841_v61 = vsub.f32 1.0, %v1840_v57  ;;  %v1865_v42 = vand.u32 2147483648, %v3853_v17  ;;  %v1698_v39 = vand.u32 2147483647, %v3855_v20  ;;  %v1700_v54 = vand.u32 2147483648, %v3855_v20  ;;  %2695 = vmatmul.msk.bf16.vlgmr.msra.gmra.mxu0 %vm576_vm0, %v2032_v11 }
 0x329   : > { %v1943_v21 = vmul.f32 %v3702_v29, %v1912_v58  ;;  %v1797_v1 = vmul.f32 %v3850_v15, %v1796_v44  ;;  %vm1800_vm9 = vweird.f32 %v3850_v15  ;;  %vm1845_vm10 = vweird.f32 %v3873_v3 }
 0x32a   : > { %v1842_v4 = vmul.f32 %v3873_v3, %v1841_v61  ;;  %vm1859_vm11 = vweird.f32 %v3853_v17  ;;  %v1927_v29 = vsel %vm3858_vm3, %v1926_v32, %v1922_v14  ;;  %vm1799_vm12 = vweird.f32 %v3811_v30  ;;  %vm3951_vm2 = vmor %vm1844_vm6, %vm1845_vm10 }
 0x32b   : > { %v3904_v60 = vpop.eup %2933  ;;  %1959 = vst.msk [vmem:[%s3774_s15 + $0x70] sm:$0xff] %vm576_vm0, %v1943_v21  ;;  %vm1694_vm13 = vweird.f32 %v3855_v20  ;;  %vm3937_vm14 = vcmp.eq.f32.partialorder %v1863_v36, 8.507059e+37  ;;  %v1866_v12 = vor.u32 1.1754944e-38, %v1865_v42  ;;  %vm3941_vm15 = vcmp.eq.f32.partialorder %v1698_v39, 8.507059e+37 }
 0x32c   : > { %v3915_v63 = vpop.xlane.xlu0 %1645  ;;  %v2936_v0 = vpop.eup %2935  ;;  %v1855_v5 = vmul.f32 %v3904_v60, %v3853_v17  ;;  %v2775_v7 = vld [vmem:[#allocation4 + $0x20] sm:$0xff]  ;;  %v1843_v13 = vadd.f32 %v3873_v3, %v1842_v4  ;;  %v1798_v24 = vadd.f32 %v3850_v15, %v1797_v1  ;;  %v1701_v2 = vor.u32 1.1754944e-38, %v1700_v54 }
 0x32d   : > { %v3917_v35 = vpop.xlane.xlu2 %1648  ;;  %2937 = vrcp.f32 %v3915_v63  ;;  %v1690_v10 = vmul.f32 %v2936_v0, %v3855_v20  ;;  %2106 = vmatpush.bf16.msra.mxu1 %v2775_v7  ;;  %v1713_v25 = vand.u32 2147483647, %v3915_v63  ;;  %v1944_v26 = vmul.f32 %v3707_v31, %v1927_v29 }
 0x32e   : > { %v1856_v16 = vsub.f32 1.0, %v1855_v5  ;;  %2939 = vrcp.f32 %v3917_v35  ;;  %vm3957_vm3 = vcmp.eq.f32.partialorder %v1803_v38, 8.507059e+37  ;;  %vm1695_vm4 = vweird.f32 %v2936_v0 }
 0x32f   : > { %v1691_v22 = vsub.f32 1.0, %v1690_v10  ;;  %v1975_v33 = vpack.c.bf16 %v1943_v21, %v1943_v21  ;;  %v1847_v41 = vsel %vm3951_vm2, %v3873_v3, %v1843_v13  ;;  %vm1860_vm5 = vweird.f32 %v3904_v60  ;;  %1960 = vst.msk [vmem:[%s3774_s15 + $0x78] sm:$0xff] %vm576_vm0, %v1944_v26  ;;  %vm1696_vm10 = vmor %vm1694_vm13, %vm1695_vm4 }
 0x330   : > { %v1857_v19 = vmul.f32 %v3904_v60, %v1856_v16  ;;  %2705 = vmatmul.msk.bf16.vlgmr.msra.gmra.mxu1 %vm576_vm0, %v2079_v37  ;;  %vm1709_vm6 = vweird.f32 %v3915_v63  ;;  %v1715_v31 = vand.u32 2147483648, %v3915_v63  ;;  %v1976_v38 = vpack.c.bf16 %v1944_v26, %v1944_v26  ;;  %vm1861_vm13 = vmor %vm1859_vm11, %vm1860_vm5 }
 0x331   : > { %v1692_v32 = vmul.f32 %v2936_v0, %v1691_v22  ;;  %vm3972_vm7 = vcmp.eq.f32.partialorder %v1713_v25, 8.507059e+37  ;;  %vm1724_vm2 = vweird.f32 %v3917_v35  ;;  %v1728_v51 = vand.u32 2147483647, %v3917_v35 }
 0x332   : > { %v1858_v44 = vadd.f32 %v3904_v60, %v1857_v19  ;;  %v1852_v55 = vsel %vm3906_vm8, %v3894_v43, %v1847_v41  ;;  %v2124_v14 = vunpack.c.l.b16 %v1975_v33  ;;  %v1730_v42 = vand.u32 2147483648, %v3917_v35  ;;  %vm3999_vm8 = vmor %vm1799_vm12, %vm1800_vm9 }
 0x333   : > { %v2938_v59 = vpop.eup %2937  ;;  %v1693_v57 = vadd.f32 %v2936_v0, %v1692_v32  ;;  %v2125_v39 = vunpack.c.l.b16 %v1976_v38  ;;  %v1939_v21 = vmul.f32 %v3714_v40, %v1852_v55  ;;  %v1802_v30 = vsel %vm3999_vm8, %v3850_v15, %v1798_v24 }
 0x334   : > { %v1705_v37 = vmul.f32 %v2938_v59, %v3915_v63  ;;  %v3976_v3 = vpop.xlane.xlu0 %1651  ;;  %v2940_v11 = vpop.eup %2939  ;;  %vm1710_vm4 = vweird.f32 %v2938_v59  ;;  %v1862_v17 = vsel %vm1861_vm13, %v3904_v60, %v1858_v44  ;;  %v1716_v40 = vor.u32 1.1754944e-38, %v1715_v31 }
 0x335   : > { %2941 = vrcp.f32 %v3976_v3  ;;  %v1697_v61 = vsel %vm1696_vm10, %v2936_v0, %v1693_v57  ;;  %v1720_v58 = vmul.f32 %v2940_v11, %v3917_v35  ;;  %vm1725_vm11 = vweird.f32 %v2940_v11  ;;  %1955 = vst.msk [vmem:[%s3774_s15 + $0x50] sm:$0xff] %vm576_vm0, %v1939_v21  ;;  %vm1711_vm9 = vmor %vm1709_vm6, %vm1710_vm4 }
 0x336   : > { %v1706_v36 = vsub.f32 1.0, %v1705_v37  ;;  %v1702_v20 = vsel %vm3941_vm15, %v1701_v2, %v1697_v61  ;;  %v1867_v0 = vsel %vm3937_vm14, %v1866_v12, %v1862_v17  ;;  %v2127_v7 = vpack.c.b16 %v2125_v39, %v2124_v14  ;;  %vm1726_vm14 = vmor %vm1724_vm2, %vm1725_vm11 }
 0x337   : > { %v1721_v54 = vsub.f32 1.0, %v1720_v58  ;;  %v1929_v1 = vmul.f32 %v3727_v47, %v1702_v20  ;;  %v1940_v10 = vmul.f32 %v3729_v53, %v1867_v0  ;;  %vm4017_vm12 = vcmp.eq.f32.partialorder %v1728_v51, 8.507059e+37 }
 0x338   : > { %v1707_v48 = vmul.f32 %v2938_v59, %v1706_v36  ;;  %v1971_v29 = vpack.c.bf16 %v1939_v21, %v1939_v21  ;;  %v1807_v15 = vsel %vm3957_vm3, %v3876_v8, %v1802_v30  ;;  %v1731_v16 = vor.u32 1.1754944e-38, %v1730_v42  ;;  %2716 = vmatmul.msk.bf16.gmra.mxu2 %vm576_vm0, %v2127_v7 }
 0x339   : > { %v1722_v5 = vmul.f32 %v2940_v11, %v1721_v54  ;;  %1945 = vst.msk [vmem:[%s3774_s15] sm:$0xff] %vm576_vm0, %v1929_v1  ;;  %v1743_v12 = vand.u32 2147483647, %v3976_v3  ;;  %v1972_v8 = vpack.c.bf16 %v1940_v10, %v1940_v10  ;;  %v1961_v22 = vpack.c.bf16 %v1929_v1, %v1929_v1 }
 0x33a   : > { %v1708_v4 = vadd.f32 %v2938_v59, %v1707_v48  ;;  %1956 = vst.msk [vmem:[%s3774_s15 + $0x58] sm:$0xff] %vm576_vm0, %v1940_v10  ;;  %v1936_v27 = vmul.f32 %v3716_v49, %v1807_v15  ;;  %v1745_v19 = vand.u32 2147483648, %v3976_v3  ;;  %v2077_v2 = vunpack.c.l.b16 %v1971_v29 }
 0x33b   : > { %v2942_v60 = vpop.eup %2941  ;;  %v1723_v13 = vadd.f32 %v2940_v11, %v1722_v5  ;;  %v2078_v26 = vunpack.c.l.b16 %v1972_v8  ;;  %vm1739_vm3 = vweird.f32 %v3976_v3  ;;  %vm1744_vm6 = vcmp.eq.f32.partialorder %v1743_v12, 8.507059e+37 }
 0x33c   : > { %v1712_v53 = vsel %vm1711_vm9, %v2938_v59, %v1708_v4  ;;  %v1735_v18 = vmul.f32 %v2942_v60, %v3976_v3  ;;  %vm1740_vm15 = vweird.f32 %v2942_v60  ;;  %1952 = vst.msk [vmem:[%s3774_s15 + $0x38] sm:$0xff] %vm576_vm0, %v1936_v27  ;;  %v1746_v31 = vor.u32 1.1754944e-38, %v1745_v19 }
 0x33d   : > { %v1717_v63 = vsel %vm3972_vm7, %v1716_v40, %v1712_v53  ;;  %v1727_v24 = vsel %vm1726_vm14, %v2940_v11, %v1723_v13  ;;  %v2080_v41 = vpack.c.b16 %v2078_v26, %v2077_v2  ;;  %vm1741_vm5 = vmor %vm1739_vm3, %vm1740_vm15  ;;  %v1968_v17 = vpack.c.bf16 %v1936_v27, %v1936_v27 }
 0x33e   : > { %v1736_v23 = vsub.f32 1.0, %v1735_v18  ;;  %v1930_v25 = vmul.f32 %v3739_v52, %v1717_v63  ;;  %v1732_v35 = vsel %vm4017_vm12, %v1731_v16, %v1727_v24  ;;  %v1981_v52 = vunpack.c.l.b16 %v1961_v22 }
 0x33f   : > { %v1931_v33 = vmul.f32 %v3741_v56, %v1732_v35  ;;  %v2031_v1 = vunpack.c.l.b16 %v1968_v17  ;;  %v698_v30 = vmul.f32 -5.0, %v3493_v46  ;;  %v696_v10 = vmul.f32 -5.0, %v3472_v28 }
 0x340   : > { %v1737_v6 = vmul.f32 %v2942_v60, %v1736_v23  ;;  %1946 = vst.msk [vmem:[%s3774_s15 + $0x8] sm:$0xff] %vm576_vm0, %v1930_v25  ;;  %v1962_v32 = vpack.c.bf16 %v1930_v25, %v1930_v25  ;;  %2706 = vmatmul.msk.bf16.gmra.mxu1 %vm576_vm0, %v2080_v41  ;;  %v697_v12 = vmul.f32 -5.0, %v3480_v34 }
 0x341   : > { %1947 = vst.msk [vmem:[%s3774_s15 + $0x10] sm:$0xff] %vm576_vm0, %v1931_v33  ;;  %v1963_v50 = vpack.c.bf16 %v1931_v33, %v1931_v33  ;;  %v704_v5 = vmul.f32 1.442695, %v698_v30  ;;  %v700_v40 = vmul.f32 1.442695, %v696_v10 }
 0x342   : > { %v1738_v49 = vadd.f32 %v2942_v60, %v1737_v6  ;;  %v1982_v59 = vunpack.c.l.b16 %v1962_v32  ;;  %v702_v25 = vmul.f32 1.442695, %v697_v12 }
 0x343   : > { %v1983_v51 = vunpack.c.l.b16 %v1963_v50 }
 0x344   : > { %v1985_v38 = vpack.c.b16 %v1982_v59, %v1981_v52  ;;  %v1742_v44 = vsel %vm1741_vm5, %v2942_v60, %v1738_v49 }
 0x345   : > { %v1747_v57 = vsel %vm1744_vm6, %v1746_v31, %v1742_v44 }
 0x346   : > { %2685 = vmatmul.msk.bf16.vlgmr.msrb.gmra.mxu3 %vm576_vm0, %v1985_v38  ;;  %v1932_v56 = vmul.f32 %v3748_v62, %v1747_v57 }
 0x348   : > { %1948 = vst.msk [vmem:[%s3774_s15 + $0x18] sm:$0xff] %vm576_vm0, %v1932_v56  ;;  %v1964_v37 = vpack.c.bf16 %v1932_v56, %v1932_v56 }
 0x34a   : > { %v1984_v11 = vunpack.c.l.b16 %v1964_v37 }
 0x34c   : > { %v1986_v55 = vpack.c.b16 %v1984_v11, %v1983_v51 }
 0x34f   : > { %v1661_v3 = vpop.xlane.xlu1 %1660 }
 0x350   : > { %2943 = vrcp.f32 %v1661_v3  ;;  %v1790_v14 = vand.u32 2147483648, %v1661_v3  ;;  %v1788_v42 = vand.u32 2147483647, %v1661_v3  ;;  %vm1784_vm10 = vweird.f32 %v1661_v3 }
 0x351   : > { %2945 = vpow2.f32 %v704_v5  ;;  %v3208_v5 = vmov 32  }
 0x352   : > { %v1791_v39 = vor.u32 1.1754944e-38, %v1790_v14  ;;  %vm1789_vm13 = vcmp.eq.f32.partialorder %v1788_v42, 8.507059e+37  ;;  %2862 = vset.pattern.permute.xlu2 %v3208_v5  ;;  %2860 = vset.pattern.permute.xlu0 %v3208_v5 }
 0x353   : > { %2861 = vset.pattern.permute.xlu1 %v3208_v5 }
 0x356   : > { %2686 = vmatmul.msk.bf16.gmra.mxu3 %vm576_vm0, %v1986_v55  ;;  %v2944_v61 = vpop.eup %2943 }
 0x357   : > { %v1780_v36 = vmul.f32 %v2944_v61, %v1661_v3  ;;  %vm1785_vm7 = vweird.f32 %v2944_v61  ;;  %v2946_v7 = vpop.eup %2945 }
 0x358   : > { %vm1786_vm2 = vmor %vm1784_vm10, %vm1785_vm7  ;;  %v710_v60 = vadd.f32 1.0, %v2946_v7 }
 0x359   : > { %v1781_v58 = vsub.f32 1.0, %v1780_v36 }
 0x35a   : > { %2947 = vrcp.f32 %v710_v60  ;;  %vm747_vm4 = vweird.f32 %v710_v60  ;;  %v753_v8 = vand.u32 2147483648, %v710_v60  ;;  %v751_v23 = vand.u32 2147483647, %v710_v60 }
 0x35b   : > { %v1782_v20 = vmul.f32 %v2944_v61, %v1781_v58  ;;  %2949 = vpow2.f32 %v700_v40 }
 0x35c   : > { %v754_v24 = vor.u32 1.1754944e-38, %v753_v8  ;;  %vm752_vm9 = vcmp.eq.f32.partialorder %v751_v23, 8.507059e+37 }
 0x35d   : > { %v1783_v62 = vadd.f32 %v2944_v61, %v1782_v20 }
 0x35f   : > { %v1787_v43 = vsel %vm1786_vm2, %v2944_v61, %v1783_v62 }
 0x360   : > { %v1792_v48 = vsel %vm1789_vm13, %v1791_v39, %v1787_v43  ;;  %v2948_v29 = vpop.eup %2947 }
 0x361   : > { %v1935_v54 = vmul.f32 %v3757_v9, %v1792_v48  ;;  %v699_v9 = vmul.f32 -5.0, %v3491_v45  ;;  %v2950_v15 = vpop.eup %2949  ;;  %v743_v53 = vmul.f32 %v2948_v29, %v710_v60  ;;  %vm748_vm8 = vweird.f32 %v2948_v29 }
 0x362   : > { %v708_v46 = vadd.f32 1.0, %v2950_v15  ;;  %vm749_vm11 = vmor %vm747_vm4, %vm748_vm8 }
 0x363   : > { %1951 = vst.msk [vmem:[%s3774_s15 + $0x30] sm:$0xff] %vm576_vm0, %v1935_v54  ;;  %v1967_v21 = vpack.c.bf16 %v1935_v54, %v1935_v54  ;;  %v706_v47 = vmul.f32 1.442695, %v699_v9  ;;  %v744_v13 = vsub.f32 1.0, %v743_v53 }
 0x364   : > { %vm717_vm12 = vweird.f32 %v708_v46  ;;  %v723_v33 = vand.u32 2147483648, %v708_v46  ;;  %v721_v49 = vand.u32 2147483647, %v708_v46 }
 0x365   : > { %v2030_v0 = vunpack.c.l.b16 %v1967_v21  ;;  %2951 = vpow2.f32 %v706_v47  ;;  %v745_v18 = vmul.f32 %v2948_v29, %v744_v13 }
 0x366   : > { %2953 = vrcp.f32 %v708_v46  ;;  %v724_v38 = vor.u32 1.1754944e-38, %v723_v33  ;;  %vm722_vm3 = vcmp.eq.f32.partialorder %v721_v49, 8.507059e+37 }
 0x367   : > { %v2033_v4 = vpack.c.b16 %v2031_v1, %v2030_v0  ;;  %v746_v22 = vadd.f32 %v2948_v29, %v745_v18 }
 0x369   : > { %2696 = vmatmul.msk.bf16.gmra.mxu0 %vm576_vm0, %v2033_v4  ;;  %v750_v27 = vsel %vm749_vm11, %v2948_v29, %v746_v22 }
 0x36a   : > { %v755_v26 = vsel %vm752_vm9, %v754_v24, %v750_v27 }
 0x36b   : > { %v2952_v16 = vpop.eup %2951  ;;  %v774_v6 = vadd.f32 1e-05, %v755_v26 }
 0x36c   : > { %v711_v63 = vadd.f32 1.0, %v2952_v16  ;;  %v2954_v28 = vpop.eup %2953 }
 0x36d   : > { %v713_v45 = vmul.f32 %v2954_v28, %v708_v46  ;;  %vm718_vm14 = vweird.f32 %v2954_v28  ;;  %v778_v52 = vmul.f32 1.0986123, %v774_v6 }
 0x36e   : > { %2955 = vrcp.f32 %v711_v63  ;;  %vm719_vm15 = vmor %vm717_vm12, %vm718_vm14  ;;  %vm762_vm5 = vweird.f32 %v711_v63  ;;  %v768_v50 = vand.u32 2147483648, %v711_v63  ;;  %v766_v11 = vand.u32 2147483647, %v711_v63 }
 0x36f   : > { %v714_v19 = vsub.f32 1.0, %v713_v45  ;;  %2957 = vpow2.f32 %v702_v25  ;;  %v784_v57 = vmul.f32 1.442695, %v778_v52 }
 0x370   : > { %v769_v58 = vor.u32 1.1754944e-38, %v768_v50  ;;  %vm767_vm10 = vcmp.eq.f32.partialorder %v766_v11, 8.507059e+37 }
 0x371   : > { %v715_v35 = vmul.f32 %v2954_v28, %v714_v19 }
 0x373   : > { %v716_v41 = vadd.f32 %v2954_v28, %v715_v35 }
 0x374   : > { %v2956_v2 = vpop.eup %2955 }
 0x375   : > { %v758_v34 = vmul.f32 %v2956_v2, %v711_v63  ;;  %v2958_v32 = vpop.eup %2957  ;;  %v720_v44 = vsel %vm719_vm15, %v2954_v28, %v716_v41  ;;  %vm763_vm6 = vweird.f32 %v2956_v2 }
 0x376   : > { %v4063_v31 = vadd.f32 1.0, %v2958_v32  ;;  %v725_v37 = vsel %vm722_vm3, %v724_v38, %v720_v44  ;;  %vm764_vm7 = vmor %vm762_vm5, %vm763_vm6 }
 0x377   : > { %v759_v59 = vsub.f32 1.0, %v758_v34  ;;  %v772_v55 = vadd.f32 1e-05, %v725_v37 }
 0x378   : > { %2959 = vrcp.f32 %v4063_v31  ;;  %vm732_vm2 = vweird.f32 %v4063_v31  ;;  %v738_v9 = vand.u32 2147483648, %v4063_v31  ;;  %v736_v15 = vand.u32 2147483647, %v4063_v31 }
 0x379   : > { %v760_v56 = vmul.f32 %v2956_v2, %v759_v59  ;;  %2961 = vpow2.f32 %v784_v57  ;;  %v776_v42 = vmul.f32 1.0986123, %v772_v55 }
 0x37a   : > { %v739_v18 = vor.u32 1.1754944e-38, %v738_v9  ;;  %vm737_vm8 = vcmp.eq.f32.partialorder %v736_v15, 8.507059e+37 }
 0x37b   : > { %v761_v3 = vadd.f32 %v2956_v2, %v760_v56  ;;  %v780_v0 = vmul.f32 1.442695, %v776_v42 }
 0x37d   : > { %v765_v14 = vsel %vm764_vm7, %v2956_v2, %v761_v3 }
 0x37e   : > { %v2960_v36 = vpop.eup %2959  ;;  %v770_v39 = vsel %vm767_vm10, %v769_v58, %v765_v14 }
 0x37f   : > { %v2962_v20 = vpop.eup %2961  ;;  %v728_v62 = vmul.f32 %v2960_v36, %v4063_v31  ;;  %v775_v30 = vadd.f32 1e-05, %v770_v39  ;;  %vm733_vm13 = vweird.f32 %v2960_v36 }
 0x380   : > { %v4068_v17 = vadd.f32 -1.0, %v2962_v20  ;;  %vm734_vm4 = vmor %vm732_vm2, %vm733_vm13 }
 0x381   : > { %v729_v1 = vsub.f32 1.0, %v728_v62  ;;  %v779_v10 = vmul.f32 1.0986123, %v775_v30 }
 0x382   : > { %2963 = vrcp.f32 %v4068_v17  ;;  %vm871_vm11 = vweird.f32 %v4068_v17  ;;  %v877_v32 = vand.u32 2147483648, %v4068_v17  ;;  %v875_v49 = vand.u32 2147483647, %v4068_v17 }
 0x383   : > { %2965 = vpow2.f32 %v780_v0  ;;  %v730_v7 = vmul.f32 %v2960_v36, %v729_v1  ;;  %v786_v53 = vmul.f32 1.442695, %v779_v10 }
 0x384   : > { %v878_v38 = vor.u32 1.1754944e-38, %v877_v32  ;;  %vm876_vm14 = vcmp.eq.f32.partialorder %v875_v49, 8.507059e+37  ;;  %v3211_v49 = vmov 34  }
 0x385   : > { %v731_v29 = vadd.f32 %v2960_v36, %v730_v7  ;;  %2967 = vpow2.f32 %v786_v53 }
 0x387   : > { %v735_v63 = vsel %vm734_vm4, %v2960_v36, %v731_v29 }
 0x388   : > { %v2964_v13 = vpop.eup %2963  ;;  %v740_v22 = vsel %vm737_vm8, %v739_v18, %v735_v63 }
 0x389   : > { %v2966_v16 = vpop.eup %2965  ;;  %v867_v12 = vmul.f32 %v2964_v13, %v4068_v17  ;;  %v773_v24 = vadd.f32 1e-05, %v740_v22  ;;  %vm872_vm9 = vweird.f32 %v2964_v13 }
 0x38a   : > { %v2589_v28 = vadd.f32 -1.0, %v2966_v16  ;;  %vm873_vm12 = vmor %vm871_vm11, %vm872_vm9  ;;  %vm2193_vm9 = vcmask 126016  }
 0x38b   : > { %v868_v23 = vsub.f32 1.0, %v867_v12  ;;  %v2968_v25 = vpop.eup %2967  ;;  %v777_v26 = vmul.f32 1.0986123, %v773_v24 }
 0x38c   : > { %2969 = vrcp.f32 %v2589_v28  ;;  %v4082_v2 = vadd.f32 -1.0, %v2968_v25  ;;  %vm841_vm15 = vweird.f32 %v2589_v28  ;;  %v847_v58 = vand.u32 2147483648, %v2589_v28 }
 0x38d   : > { %v869_v19 = vmul.f32 %v2964_v13, %v868_v23  ;;  %v782_v52 = vmul.f32 1.442695, %v777_v26  ;;  %v845_v42 = vand.u32 2147483647, %v2589_v28  ;;  %v3210_v23 = vmov 33  }
 0x38e   : > { %2971 = vrcp.f32 %v4082_v2  ;;  %vm886_vm7 = vweird.f32 %v4082_v2  ;;  %v892_v1 = vand.u32 2147483648, %v4082_v2  ;;  %v890_v5 = vand.u32 2147483647, %v4082_v2 }
 0x38f   : > { %v870_v41 = vadd.f32 %v2964_v13, %v869_v19  ;;  %2973 = vpow2.f32 %v782_v52  ;;  %vm846_vm6 = vcmp.eq.f32.partialorder %v845_v42, 8.507059e+37  ;;  %v2782_v52 = vld [vmem:[%s4343_s9 + $0x8] sm:$0xff]  ;;  %v792_v42 = vlaneseq }
 0x390   : > { %vm891_vm13 = vcmp.eq.f32.partialorder %v890_v5, 8.507059e+37  ;;  %2294 = vmatpush.bf16.msra.mxu3 %v2782_v52 }
 0x391   : > { %v874_v44 = vsel %vm873_vm12, %v2964_v13, %v870_v41  ;;  %vm2218_vm12 = vcmask 191616  }
 0x392   : > { %v2970_v6 = vpop.eup %2969  ;;  %v4090_v3 = vsel %vm876_vm14, %v878_v38, %v874_v44  ;;  %v3212_v44 = vmov 35   ;;  %vm2243_vm14 = vcmask 257216  }
 0x393   : > { %v837_v59 = vmul.f32 %v2970_v6, %v2589_v28  ;;  %vm842_vm3 = vweird.f32 %v2970_v6 }
 0x394   : > { %v2972_v37 = vpop.eup %2971  ;;  %vm843_vm5 = vmor %vm841_vm15, %vm842_vm3 }
 0x395   : > { %v838_v56 = vsub.f32 1.0, %v837_v59  ;;  %v2974_v36 = vpop.eup %2973  ;;  %vm887_vm10 = vweird.f32 %v2972_v37  ;;  %v898_v59 = vmul.f32 0.3989423, %v4090_v3 }
 0x396   : > { %v2590_v39 = vadd.f32 -1.0, %v2974_v36  ;;  %vm888_vm2 = vmor %vm886_vm7, %vm887_vm10 }
 0x397   : > { %v839_v55 = vmul.f32 %v2970_v6, %v838_v56 }
 0x398   : > { %2975 = vrcp.f32 %v2590_v39  ;;  %v860_v24 = vand.u32 2147483647, %v2590_v39 }
 0x399   : > { %v840_v20 = vadd.f32 %v2970_v6, %v839_v55 }
 0x39a   : > { %vm861_vm11 = vcmp.eq.f32.partialorder %v860_v24, 8.507059e+37 }
 0x39b   : > { %v844_v17 = vsel %vm843_vm5, %v2970_v6, %v840_v20 }
 0x3a5   : > { %v2061_v51 = vpop.f32.mrf.mxu0 }
 0x3a6   : > { %v2173_v61 = vpack.c.bf16 %v2061_v51, %v2061_v51  ;;  %v902_v51 = vmul.f32 -0.5, %v4090_v3 }
 0x3a8   : > { %2181 = vrot.lane.b32.xlu2 %v2173_v61, %s3206_s11  ;;  %v882_v61 = vmul.f32 %v2972_v37, %v4082_v2  ;;  %v4097_v14 = vmul.f32 %v902_v51, %v4090_v3 }
 0x3aa   : > { %v2155_v43 = vpop.f32.mrf.mxu2  ;;  %v883_v62 = vsub.f32 1.0, %v882_v61 }
 0x3ab   : > { %v2223_v46 = vpack.c.bf16 %v2155_v43, %v2155_v43 }
 0x3ad   : > { %v2108_v48 = vpop.f32.mrf.mxu1  ;;  %v2063_v21 = vpop.f32.mrf.mxu0 }
 0x3ae   : > { %v2198_v54 = vpack.c.bf16 %v2108_v48, %v2108_v48  ;;  %v2174_v4 = vpack.c.bf16 %v2063_v21, %v2063_v21  ;;  %v884_v21 = vmul.f32 %v2972_v37, %v883_v62 }
 0x3b0   : > { %2206 = vrot.lane.b32.xlu1 %v2198_v54, %s3207_s30  ;;  %2183 = vrot.lane.b32.xlu0 %v2174_v4, %s3206_s11  ;;  %v848_v54 = vor.u32 1.1754944e-38, %v847_v58  ;;  %v885_v4 = vadd.f32 %v2972_v37, %v884_v21 }
 0x3b2   : > { %v2157_v47 = vpop.f32.mrf.mxu2  ;;  %v849_v0 = vsel %vm846_vm6, %v848_v54, %v844_v17  ;;  %v889_v9 = vsel %vm888_vm2, %v2972_v37, %v885_v4 }
 0x3b3   : > { %v2224_v8 = vpack.c.bf16 %v2157_v47, %v2157_v47  ;;  %v4103_v30 = vmul.f32 0.3989423, %v849_v0  ;;  %v900_v25 = vmul.f32 -0.5, %v849_v0 }
 0x3b5   : > { %v2110_v60 = vpop.f32.mrf.mxu1  ;;  %v904_v26 = vmul.f32 %v900_v25, %v849_v0 }
 0x3b6   : > { %v2199_v40 = vpack.c.bf16 %v2110_v60, %v2110_v60  ;;  %v2976_v60 = vpop.eup %2975 }
 0x3b7   : > { %v852_v47 = vmul.f32 %v2976_v60, %v2590_v39  ;;  %vm857_vm4 = vweird.f32 %v2976_v60 }
 0x3b8   : > { %2208 = vrot.lane.b32.xlu2 %v2199_v40, %s3207_s30  ;;  %2231 = vrot.lane.b32.xlu0 %v2223_v46, %s3209_s12  ;;  %v893_v40 = vor.u32 1.1754944e-38, %v892_v1 }
 0x3b9   : > { %v853_v13 = vsub.f32 1.0, %v852_v47 }
 0x3ba   : > { %v894_v15 = vsel %vm891_vm13, %v893_v40, %v889_v9 }
 0x3bb   : > { %v4080_v45 = vpop.f32.mrf.mxu2  ;;  %v4108_v46 = vmul.f32 0.3989423, %v894_v15  ;;  %v854_v18 = vmul.f32 %v2976_v60, %v853_v13 }
 0x3bc   : > { %v2225_v2 = vpack.c.bf16 %v4080_v45, %v4080_v45 }
 0x3bd   : > { %v2113_v27 = vpop.f32.mrf.mxu1  ;;  %v855_v22 = vadd.f32 %v2976_v60, %v854_v18 }
 0x3be   : > { %v2200_v35 = vpack.c.bf16 %v2113_v27, %v2113_v27 }
 0x3c0   : > { %2233 = vrot.lane.b32.xlu2 %v2224_v8, %s3209_s12  ;;  %v862_v8 = vand.u32 2147483648, %v2590_v39 }
 0x3c2   : > { %v863_v27 = vor.u32 1.1754944e-38, %v862_v8 }
 0x3c3   : > { %v2162_v31 = vpop.f32.mrf.mxu2 }
 0x3c4   : > { %v2226_v57 = vpack.c.bf16 %v2162_v31, %v2162_v31  ;;  %v2781_v31 = vld [vmem:[%s4343_s9] sm:$0xff] }
 0x3c5   : > { %v2115_v16 = vpop.f32.mrf.mxu1  ;;  %2295 = vmatpush.bf16.msra.mxu3 %v2781_v31 }
 0x3c6   : > { %v2201_v12 = vpack.c.bf16 %v2115_v16, %v2115_v16 }
 0x3c8   : > { %2210 = vrot.lane.b32.xlu2 %v2200_v35, %s3207_s30 }
 0x3c9   : > { %v2014_v34 = vpop.f32.mrf.mxu3 }
 0x3ca   : > { %v2165_v33 = vpack.c.bf16 %v2014_v34, %v2014_v34 }
 0x3cc   : > { %2169 = vst.msk [vmem:[#allocation5] sm:$0xf] %vm815_vm1, %v2165_v33  ;;  %v903_v33 = vmul.f32 -0.5, %v894_v15 }
 0x3ce   : > { %v907_v41 = vmul.f32 %v903_v33, %v894_v15 }
 0x3d0   : > { %2237 = vrot.lane.b32.xlu2 %v2226_v57, %s3209_s12 }
 0x3d1   : > { %v2016_v50 = vpop.f32.mrf.mxu3 }
 0x3d2   : > { %v2166_v11 = vpack.c.bf16 %v2016_v50, %v2016_v50 }
 0x3d4   : > { %2170 = vst.msk [vmem:[#allocation5 + $0x4] sm:$0xf] %vm815_vm1, %v2166_v11 }
 0x3d8   : > { %920 = vperm.xlu2 %2862, %v4097_v14  }
 0x3d9   : > { %v2019_v43 = vpop.f32.mrf.mxu3 }
 0x3da   : > { %v2167_v48 = vpack.c.bf16 %v2019_v43, %v2019_v43  ;;  %v793_v43 = vshrl.u32 %v792_v42, 7 }
 0x3dc   : > { %2171 = vst.msk [vmem:[#allocation5 + $0x8] sm:$0xf] %vm815_vm1, %v2167_v48  ;;  %v794_v0 = vadd.s32 8, %v793_v43  ;;  %v795_v1 = vadd.s32 16, %v793_v43  ;;  %v796_v15 = vadd.s32 24, %v793_v43 }
 0x3e0   : > { %942 = vperm.xlu2 %2862, %v4103_v30  }
 0x3e1   : > { %v2021_v7 = vpop.f32.mrf.mxu3 }
 0x3e2   : > { %v2168_v10 = vpack.c.bf16 %v2021_v7, %v2021_v7 }
 0x3e4   : > { %2172 = vst.msk [vmem:[#allocation5 + $0xc] sm:$0xf] %vm815_vm1, %v2168_v10  ;;  %vm856_vm1 = vweird.f32 %v2590_v39 }
 0x3e5   : > { %vm858_vm8 = vmor %vm856_vm1, %vm857_vm4 }
 0x3e6   : > { %v2066_v29 = vpop.f32.mrf.mxu0  ;;  %v859_v19 = vsel %vm858_vm8, %v2976_v60, %v855_v22 }
 0x3e7   : > { %v2175_v53 = vpack.c.bf16 %v2066_v29, %v2066_v29  ;;  %v864_v35 = vsel %vm861_vm11, %v863_v27, %v859_v19 }
 0x3e8   : > { %957 = vperm.xlu2 %2862, %v4108_v46   ;;  %v901_v6 = vmul.f32 -0.5, %v864_v35  ;;  %v4119_v32 = vmul.f32 0.3989423, %v864_v35 }
 0x3e9   : > { %2185 = vrot.lane.b32.xlu0 %v2175_v53, %s3206_s11 }
 0x3ea   : > { %v905_v34 = vmul.f32 %v901_v6, %v864_v35 }
 0x3ee   : > { %v2068_v63 = vpop.f32.mrf.mxu0 }
 0x3ef   : > { %v2176_v28 = vpack.c.bf16 %v2068_v63, %v2068_v63 }
 0x3f0   : > { %2865 = vset.pattern.permute.xlu2 %v3210_v23 }
 0x3f1   : > { %2187 = vrot.lane.b32.xlu1 %v2176_v28, %s3206_s11  ;;  %2212 = vrot.lane.b32.xlu0 %v2201_v12, %s3207_s30  ;;  %s2353_s30 = sshll.u32 %s2350_s21, 4  ;;  %s2354_s30 = int_to_ptr.hbm [resolvable:$true] %s2353_s30 }
 0x3f2   : > { %1040 = vperm.xlu2 %2865, %v4097_v14   ;;  %s3083_s10 = sshra.s32 %s2354_s30, 4  ;;  %s3084_s10 = int_to_ptr.hbm [resolvable:$true] %s3083_s10 }
 0x3f3   : > { %s3085_s27 = scalar_lea.hbm %s3084_s10, 128  ;;  %p3090_p2 = scmp.lt.s32.totalorder %s3084_s10, %s4403_s18 }
 0x3f4   : > { %p3086_p6 = scmp.ne.s32.totalorder %s3084_s10, %s3085_s27  ;;  %p3091_p9 = scmp.lt.s32.totalorder %s3089_s23, %s3085_s27 }
 0x3f6   : > { %p3087_p3 = pnand %p3086_p6, %p3336_p11  ;;  %p3092_p0 = por %p3091_p9, %p3090_p2 }
 0x3f8   : > { %p3088_p10 = pneg %p3087_p3 }
 0x3f9   : > { %2235 = vrot.lane.b32.xlu1 %v2225_v2, %s3209_s12  ;;  %910 = vperm.xlu0 %2860, %v904_v26   ;;  %s4201_s12 = scalar_lea.sflag [#allocation13], %s2316_s16 }
 0x3fa   : > { %1060 = vperm.xlu2 %2865, %v4103_v30   ;;  %p3093_p1 = pnand %p3092_p0, %p3088_p10 }
 0x401   : > { %915 = vperm.xlu1 %2861, %v905_v34   ;;  %947 = vperm.xlu0 %2860, %v4119_v32  }
 0x402   : > { %1072 = vperm.xlu2 %2865, %v4108_v46   ;;  %v2182_v45 = vpop.permute.xlu2 %2181 }
 0x403   : > { %2194 = vst.msk [vmem:[#allocation5] sm:$0xf] %vm2193_vm9, %v2182_v45 }
 0x409   : > { %925 = vperm.xlu1 %2861, %v907_v41   ;;  %2863 = vset.pattern.permute.xlu0 %v3210_v23 }
 0x40a   : > { %1032 = vperm.xlu0 %2863, %v904_v26   ;;  %2867 = vset.pattern.permute.xlu2 %v3211_v49 }
 0x40b   : > { %1144 = vperm.xlu2 %2867, %v4097_v14  }
 0x411   : > { %952 = vperm.xlu1 %2861, %v898_v59  }
 0x412   : > { %1064 = vperm.xlu0 %2863, %v4119_v32   ;;  %v2209_v38 = vpop.permute.xlu2 %2208 }
 0x413   : > { %2868 = vset.pattern.permute.xlu2 %v3212_v44 }
 0x414   : > { %1240 = vperm.xlu2 %2868, %v904_v26  }
 0x419   : > { %2864 = vset.pattern.permute.xlu1 %v3210_v23 }
 0x41a   : > { %1036 = vperm.xlu1 %2864, %v905_v34   ;;  %2869 = vset.pattern.permute.xlu0 %v3212_v44  ;;  %v2234_v57 = vpop.permute.xlu2 %2233 }
 0x41b   : > { %1244 = vperm.xlu0 %2869, %v905_v34  }
 0x41c   : > { %1252 = vperm.xlu2 %2868, %v907_v41  }
 0x422   : > { %1044 = vperm.xlu1 %2864, %v907_v41   ;;  %v2207_v56 = vpop.permute.xlu1 %2206  ;;  %v2211_v37 = vpop.permute.xlu2 %2210 }
 0x423   : > { %2870 = vset.pattern.permute.xlu0 %v3211_v49  ;;  %2219 = vst.msk [vmem:[#allocation5] sm:$0xf] %vm2218_vm12, %v2207_v56  ;;  %v2184_v50 = vpop.permute.xlu0 %2183 }
 0x424   : > { %1136 = vperm.xlu0 %2870, %v904_v26   ;;  %2873 = vset.pattern.permute.xlu2 %v3211_v49  ;;  %2195 = vst.msk [vmem:[#allocation5 + $0x4] sm:$0xf] %vm2193_vm9, %v2184_v50 }
 0x425   : > { %1168 = vperm.xlu2 %2873, %v4119_v32   ;;  %2220 = vst.msk [vmem:[#allocation5 + $0x4] sm:$0xf] %vm2218_vm12, %v2209_v38 }
 0x426   : > { %2245 = vst.msk [vmem:[#allocation5 + $0x4] sm:$0xf] %vm2243_vm14, %v2234_v57 }
 0x42a   : > { %1068 = vperm.xlu1 %2864, %v898_v59   ;;  %v2238_v3 = vpop.permute.xlu2 %2237 }
 0x42b   : > { %v2232_v11 = vpop.permute.xlu0 %2231 }
 0x42c   : > { %1172 = vperm.xlu0 %2870, %v898_v59   ;;  %2244 = vst.msk [vmem:[#allocation5] sm:$0xf] %vm2243_vm14, %v2232_v11 }
 0x42d   : > { %2874 = vset.pattern.permute.xlu2 %v3212_v44 }
 0x42e   : > { %1268 = vperm.xlu2 %2874, %v4103_v30  }
 0x432   : > { %2866 = vset.pattern.permute.xlu1 %v3211_v49  ;;  %v921_v51 = vpop.permute.xlu2 %920 }
 0x433   : > { %1140 = vperm.xlu1 %2866, %v905_v34   ;;  %v2779_v55 = vld [vmem:[#allocation5] sm:$0xff] }
 0x434   : > { %2876 = vset.pattern.permute.xlu0 %v3212_v44  ;;  %2733 = vmatmul.msk.bf16.vlgmr.msra.gmra.mxu3 %vm576_vm0, %v2779_v55 }
 0x435   : > { %1280 = vperm.xlu0 %2876, %v4108_v46  }
 0x436   : > { %1276 = vperm.xlu2 %2874, %v898_v59  }
 0x43a   : > { %v943_v61 = vpop.permute.xlu2 %942 }
 0x43b   : > { %1148 = vperm.xlu1 %2866, %v907_v41  }
 0x442   : > { %v4142_v36 = vpop.permute.xlu2 %957 }
 0x443   : > { %2871 = vset.pattern.permute.xlu1 %v3212_v44 }
 0x444   : > { %1248 = vperm.xlu1 %2871, %v4097_v14   ;;  %v798_v14 = vand.u32 127, %v792_v42 }
 0x446   : > { %v799_v48 = vsub.s32 %v793_v43, %v798_v14  ;;  %v800_v5 = vsub.s32 %v794_v0, %v798_v14  ;;  %v801_v7 = vsub.s32 %v795_v1, %v798_v14  ;;  %v802_v16 = vsub.s32 %v796_v15, %v798_v14 }
 0x448   : > { %v803_v21 = vmul.u32 %v799_v48, %v799_v48  ;;  %v804_v9 = vmul.u32 %v800_v5, %v800_v5  ;;  %v805_v47 = vmul.u32 %v801_v7, %v801_v7  ;;  %v806_v25 = vmul.u32 %v802_v16, %v802_v16 }
 0x44a   : > { %v4161_v4 = vcvt.s32.f32 %v803_v21  ;;  %v4167_v13 = vcvt.s32.f32 %v805_v47  ;;  %v4180_v2 = vcvt.s32.f32 %v806_v25 }
 0x44c   : > { %2872 = vset.pattern.permute.xlu1 %v3211_v49  ;;  %v4146_v58 = vpop.permute.xlu2 %1040  ;;  %v930_v8 = vmul.f32 %v921_v51, %v4167_v13 }
 0x44d   : > { %1164 = vperm.xlu1 %2872, %v4103_v30  }
 0x44e   : > { %v936_v19 = vmul.f32 1.442695, %v930_v8 }
 0x454   : > { %v4149_v20 = vpop.permute.xlu2 %1060 }
 0x455   : > { %1176 = vperm.xlu1 %2872, %v4108_v46   ;;  %v4165_v46 = vcvt.s32.f32 %v804_v9 }
 0x45b   : > { %v2186_v62 = vpop.permute.xlu0 %2185 }
 0x45c   : > { %2196 = vst.msk [vmem:[#allocation5 + $0x8] sm:$0xf] %vm2193_vm9, %v2186_v62  ;;  %v4153_v39 = vpop.permute.xlu2 %1072 }
 0x45d   : > { %2221 = vst.msk [vmem:[#allocation5 + $0x8] sm:$0xf] %vm2218_vm12, %v2211_v37  ;;  %2875 = vset.pattern.permute.xlu1 %v3212_v44 }
 0x45e   : > { %1272 = vperm.xlu1 %2875, %v4119_v32  }
 0x463   : > { %v2188_v54 = vpop.permute.xlu1 %2187  ;;  %v2213_v17 = vpop.permute.xlu0 %2212 }
 0x464   : > { %2197 = vst.msk [vmem:[#allocation5 + $0xc] sm:$0xf] %vm2193_vm9, %v2188_v54 }
 0x465   : > { %2222 = vst.msk [vmem:[#allocation5 + $0xc] sm:$0xf] %vm2218_vm12, %v2213_v17  ;;  %v4159_v30 = vpop.permute.xlu2 %1144 }
 0x466   : > { %2247 = vst.msk [vmem:[#allocation5 + $0xc] sm:$0xf] %vm2243_vm14, %v2238_v3 }
 0x46b   : > { %v2236_v10 = vpop.permute.xlu1 %2235  ;;  %v911_v60 = vpop.permute.xlu0 %910 }
 0x46c   : > { %2246 = vst.msk [vmem:[#allocation5 + $0x8] sm:$0xf] %vm2243_vm14, %v2236_v10  ;;  %v928_v40 = vmul.f32 %v911_v60, %v4161_v4 }
 0x46e   : > { %v932_v29 = vmul.f32 1.442695, %v928_v40  ;;  %v1241_v53 = vpop.permute.xlu2 %1240 }
 0x46f   : > { %v1255_v26 = vmul.f32 %v1241_v53, %v4161_v4 }
 0x470   : > { %2977 = vpow2.f32 %v932_v29 }
 0x471   : > { %v1259_v41 = vmul.f32 1.442695, %v1255_v26 }
 0x473   : > { %v916_v18 = vpop.permute.xlu1 %915  ;;  %v948_v63 = vpop.permute.xlu0 %947  ;;  %v2780_v12 = vld [vmem:[#allocation5 + $0x8] sm:$0xff] }
 0x474   : > { %v929_v28 = vmul.f32 %v916_v18, %v4165_v46  ;;  %2734 = vmatmul.msk.bf16.gmra.mxu3 %vm576_vm0, %v2780_v12 }
 0x476   : > { %v2978_v22 = vpop.eup %2977  ;;  %v934_v23 = vmul.f32 1.442695, %v929_v28  ;;  %v4172_v27 = vpop.permute.xlu2 %1252 }
 0x477   : > { %v960_v24 = vmul.f32 %v2978_v22, %v943_v61 }
 0x478   : > { %2979 = vpow2.f32 %v934_v23 }
 0x479   : > { %964 = vst.msk [vmem:[%s4176_s24] sm:$0xff] %vm576_vm0, %v960_v24  ;;  %2981 = vpow2.f32 %v936_v19 }
 0x47b   : > { %v926_v35 = vpop.permute.xlu1 %925 }
 0x47c   : > { %v931_v6 = vmul.f32 %v926_v35, %v4180_v2  ;;  %v1033_v34 = vpop.permute.xlu0 %1032 }
 0x47d   : > { %v1047_v32 = vmul.f32 %v1033_v34, %v4161_v4 }
 0x47e   : > { %v2980_v33 = vpop.eup %2979  ;;  %v938_v45 = vmul.f32 1.442695, %v931_v6 }
 0x47f   : > { %v961_v49 = vmul.f32 %v2980_v33, %v948_v63  ;;  %v1051_v52 = vmul.f32 1.442695, %v1047_v32  ;;  %v4185_v59 = vpop.permute.xlu2 %1168  ;;  %v2982_v31 = vpop.eup %2981 }
 0x480   : > { %2983 = vpow2.f32 %v938_v45 }
 0x481   : > { %965 = vst.msk [vmem:[%s4176_s24 + $0x8] sm:$0xff] %vm576_vm0, %v961_v49  ;;  %2985 = vpow2.f32 %v1051_v52 }
 0x482   : > { %2987 = vpow2.f32 %v1259_v41 }
 0x483   : > { %v953_v38 = vpop.permute.xlu1 %952 }
 0x484   : > { %v962_v44 = vmul.f32 %v2982_v31, %v953_v38  ;;  %v1065_v57 = vpop.permute.xlu0 %1064 }
 0x486   : > { %v2984_v56 = vpop.eup %2983  ;;  %966 = vst.msk [vmem:[%s4176_s24 + $0x10] sm:$0xff] %vm576_vm0, %v962_v44 }
 0x487   : > { %v2986_v37 = vpop.eup %2985  ;;  %v963_v50 = vmul.f32 %v2984_v56, %v4142_v36 }
 0x488   : > { %v1075_v3 = vmul.f32 %v2986_v37, %v4149_v20 }
 0x489   : > { %3096 = shalt.err (!%p3093_p1)
}
 0x48a   : > { %s3213_s16 = smov 128   ;;  %v2988_v11 = vpop.eup %2987  ;;  %967 = vst.msk [vmem:[%s4176_s24 + $0x18] sm:$0xff] %vm576_vm0, %v963_v50  ;;  %v1269_v51 = vpop.permute.xlu2 %1268  ;;  %v1049_v42 = vmul.f32 %v4146_v58, %v4167_v13  ;;  %v1153_v43 = vmul.f32 %v4159_v30, %v4167_v13  ;;  %v1258_v58 = vmul.f32 %v4172_v27, %v4180_v2  ;;  %s4255_s10 = scalar_lea.vmem [#allocation11], %s3411_s22 }
 0x48b   : > { %2791 = dma.vmem_to_hbm [thread:$0]  (%p3336_p11), %s2352_s19, 2048, %s2354_s30, %s4201_s12, %s3213_s16, %s3213_s16, %s3206_s11   ;;  %v1283_v55 = vmul.f32 %v2988_v11, %v1269_v51 }
 0x48c   : > { %2593 = vst.msk [vmem:[%s4176_s24 + $0x20] sm:$0xff] %vm576_vm0, %v1075_v3  ;;  %v1037_v61 = vpop.permute.xlu1 %1036  ;;  %v1055_v14 = vmul.f32 1.442695, %v1049_v42  ;;  %v1159_v48 = vmul.f32 1.442695, %v1153_v43  ;;  %s4405_s30 = sld [smem:[#allocation26_spill]] }
 0x48d   : > { %2601 = vst.msk [vmem:[%s4176_s24 + $0x60] sm:$0xff] %vm576_vm0, %v1283_v55  ;;  %v1048_v36 = vmul.f32 %v1037_v61, %v4165_v46  ;;  %v4224_v20 = vpop.permute.xlu0 %1244  ;;  %v1265_v10 = vmul.f32 1.442695, %v1258_v58  ;;  %s4406_s15 = sld [smem:[#allocation29_spill]]  ;;  %s2368_s14 = sshll.u32 %s4176_s24, 4  ;;  %s2369_s14 = int_to_ptr.vmem [resolvable:$true] %s2368_s14 }
 0x48e   : > { %v1256_v41 = vmul.f32 %v4224_v20, %v4165_v46 }
 0x48f   : > { %v1053_v62 = vmul.f32 1.442695, %v1048_v36 }
 0x490   : > { %v1261_v31 = vmul.f32 1.442695, %v1256_v41 }
 0x491   : > { %2989 = vpow2.f32 %v1053_v62 }
 0x492   : > { %2991 = vpow2.f32 %v1055_v14  ;;  %v2880_v19 = vld [vmem:[%s4405_s30] ss:$0 sm:$0xff] }
 0x493   : > { %2993 = vpow2.f32 %v1159_v48  ;;  %s2367_s20 = scalar_lea.hbm %s4406_s15, %s2784_s25  ;;  %s3117_s25 = scalar_lea.hbm %s4406_s15, 256 }
 0x494   : > { %v1045_v54 = vpop.permute.xlu1 %1044  ;;  %s2370_s23 = sshll.u32 %s2367_s20, 4  ;;  %s2371_s23 = int_to_ptr.hbm [resolvable:$true] %s2370_s23 }
 0x495   : > { %v1050_v17 = vmul.f32 %v1045_v54, %v4180_v2  ;;  %s3111_s13 = sshra.s32 %s2371_s23, 4  ;;  %s3112_s13 = int_to_ptr.hbm [resolvable:$true] %s3111_s13 }
 0x496   : > { %v1137_v21 = vpop.permute.xlu0 %1136  ;;  %s3113_s21 = scalar_lea.hbm %s3112_s13, 128  ;;  %p3118_p8 = scmp.lt.s32.totalorder %s3112_s13, %s4406_s15 }
 0x497   : > { %v2990_v0 = vpop.eup %2989  ;;  %v1057_v1 = vmul.f32 1.442695, %v1050_v17  ;;  %p3114_p4 = scmp.ne.s32.totalorder %s3112_s13, %s3113_s21  ;;  %p3119_p13 = scmp.lt.s32.totalorder %s3117_s25, %s3113_s21 }
 0x498   : > { %v1076_v5 = vmul.f32 %v2990_v0, %v1065_v57  ;;  %v2992_v30 = vpop.eup %2991 }
 0x499   : > { %2995 = vpow2.f32 %v1057_v1  ;;  %v2994_v40 = vpop.eup %2993  ;;  %p3115_p7 = pnand %p3114_p4, %p3336_p11  ;;  %p3120_p6 = por %p3119_p13, %p3118_p8 }
 0x49a   : > { %2594 = vst.msk [vmem:[%s4176_s24 + $0x28] sm:$0xff] %vm576_vm0, %v1076_v5  ;;  %2997 = vpow2.f32 %v1265_v10 }
 0x49b   : > { %p3116_p5 = pneg %p3115_p7 }
 0x49c   : > { %v1069_v7 = vpop.permute.xlu1 %1068 }
 0x49d   : > { %v1077_v60 = vmul.f32 %v2992_v30, %v1069_v7  ;;  %p3121_p3 = pnand %p3120_p6, %p3116_p5 }
 0x49e   : > { %v1173_v9 = vpop.permute.xlu0 %1172 }
 0x49f   : > { %v2996_v47 = vpop.eup %2995  ;;  %2595 = vst.msk [vmem:[%s4176_s24 + $0x30] sm:$0xff] %vm576_vm0, %v1077_v60  ;;  %v1181_v29 = vmul.f32 %v2994_v40, %v1173_v9 }
 0x4a0   : > { %v1078_v15 = vmul.f32 %v2996_v47, %v4153_v39  ;;  %v2998_v18 = vpop.eup %2997  ;;  %v1151_v39 = vmul.f32 %v1137_v21, %v4161_v4 }
 0x4a1   : > { %2599 = vst.msk [vmem:[%s4176_s24 + $0x50] sm:$0xff] %vm576_vm0, %v1181_v29 }
 0x4a2   : > { %2596 = vst.msk [vmem:[%s4176_s24 + $0x38] sm:$0xff] %vm576_vm0, %v1078_v15  ;;  %v1155_v25 = vmul.f32 1.442695, %v1151_v39 }
 0x4a5   : > { %v1141_v53 = vpop.permute.xlu1 %1140 }
 0x4a6   : > { %v1152_v16 = vmul.f32 %v1141_v53, %v4165_v46 }
 0x4a7   : > { %v1281_v63 = vpop.permute.xlu0 %1280 }
 0x4a8   : > { %v1157_v12 = vmul.f32 1.442695, %v1152_v16  ;;  %v1286_v28 = vmul.f32 %v2998_v18, %v1281_v63 }
 0x4aa   : > { %2999 = vpow2.f32 %v1157_v12  ;;  %2604 = vst.msk [vmem:[%s4176_s24 + $0x78] sm:$0xff] %vm576_vm0, %v1286_v28 }
 0x4ab   : > { %3001 = vpow2.f32 %v1155_v25 }
 0x4ad   : > { %v1149_v8 = vpop.permute.xlu1 %1148 }
 0x4ae   : > { %v1154_v26 = vmul.f32 %v1149_v8, %v4180_v2  ;;  %v1277_v2 = vpop.permute.xlu2 %1276 }
 0x4b0   : > { %v3000_v22 = vpop.eup %2999  ;;  %v1161_v34 = vmul.f32 1.442695, %v1154_v26 }
 0x4b1   : > { %v1180_v23 = vmul.f32 %v3000_v22, %v4185_v59 }
 0x4b3   : > { %2598 = vst.msk [vmem:[%s4176_s24 + $0x48] sm:$0xff] %vm576_vm0, %v1180_v23 }
 0x4b6   : > { %v1249_v24 = vpop.permute.xlu1 %1248 }
 0x4b7   : > { %v1257_v27 = vmul.f32 %v1249_v24, %v4167_v13  ;;  %v2297_v6 = vpop.f32.mrf.mxu3  ;;  %v3002_v13 = vpop.eup %3001 }
 0x4b8   : > { %v2298_v4 = vadd.f32 %v2880_v19, %v2297_v6 }
 0x4b9   : > { %v1263_v35 = vmul.f32 1.442695, %v1257_v27 }
 0x4ba   : > { %2307 = vst.msk [vmem:[%s4255_s10] sm:$0xff] %vm576_vm0, %v2298_v4 }
 0x4bb   : > { %3003 = vpow2.f32 %v1263_v35 }
 0x4bc   : > { %3005 = vpow2.f32 %v1161_v34 }
 0x4bd   : > { %3007 = vpow2.f32 %v1261_v31 }
 0x4bf   : > { %v1165_v32 = vpop.permute.xlu1 %1164  ;;  %v2299_v52 = vpop.f32.mrf.mxu3 }
 0x4c0   : > { %v1179_v33 = vmul.f32 %v3002_v13, %v1165_v32  ;;  %v2300_v59 = vadd.f32 %v2880_v19, %v2299_v52 }
 0x4c1   : > { %v3004_v45 = vpop.eup %3003 }
 0x4c2   : > { %v1285_v49 = vmul.f32 %v3004_v45, %v1277_v2  ;;  %2597 = vst.msk [vmem:[%s4176_s24 + $0x40] sm:$0xff] %vm576_vm0, %v1179_v33  ;;  %v3006_v38 = vpop.eup %3005 }
 0x4c3   : > { %2308 = vst.msk [vmem:[%s4255_s10 + $0x8] sm:$0xff] %vm576_vm0, %v2300_v59  ;;  %v3008_v46 = vpop.eup %3007 }
 0x4c4   : > { %2603 = vst.msk [vmem:[%s4176_s24 + $0x70] sm:$0xff] %vm576_vm0, %v1285_v49 }
 0x4c7   : > { %v1177_v44 = vpop.permute.xlu1 %1176 }
 0x4c8   : > { %v1182_v57 = vmul.f32 %v3006_v38, %v1177_v44 }
 0x4ca   : > { %2600 = vst.msk [vmem:[%s4176_s24 + $0x58] sm:$0xff] %vm576_vm0, %v1182_v57 }
 0x4d0   : > { %v1273_v56 = vpop.permute.xlu1 %1272 }
 0x4d1   : > { %v1284_v37 = vmul.f32 %v3008_v46, %v1273_v56 }
 0x4d3   : > { %2602 = vst.msk [vmem:[%s4176_s24 + $0x68] sm:$0xff] %vm576_vm0, %v1284_v37 }
 0x4d4   : > { %3124 = shalt.err (!%p3121_p3)
}
 0x4d5   : > { %2792 = dma.vmem_to_hbm [thread:$0]  (%p3336_p11), %s2369_s14, 2048, %s2371_s23, %s4201_s12, %s3213_s16, %s3213_s16, %s3206_s11  }
 0x4d6   : > { %s2783_s24 = sshll.u32 %s3305_s29, 5  ;;  %s4407_s21 = sld [smem:[#allocation27_spill]] }
 0x4d7   : > { %s2334_s30 = sshll.u32 %s4255_s10, 4  ;;  %s2312_s22 = scalar_lea.sflag [#allocation8], %s3408_s1  ;;  %s2335_s30 = int_to_ptr.vmem [resolvable:$true] %s2334_s30 }
 0x4dc   : > { %s2333_s19 = scalar_lea.hbm %s4407_s21, %s2783_s24  ;;  %s3145_s27 = scalar_lea.hbm %s4407_s21, 64 }
 0x4dd   : > { %s2336_s25 = sshll.u32 %s2333_s19, 4  ;;  %s2337_s25 = int_to_ptr.hbm [resolvable:$true] %s2336_s25 }
 0x4de   : > { %s3139_s12 = sshra.s32 %s2337_s25, 4  ;;  %s3140_s12 = int_to_ptr.hbm [resolvable:$true] %s3139_s12 }
 0x4df   : > { %s3141_s29 = scalar_lea.hbm %s3140_s12, 32  ;;  %p3146_p0 = scmp.lt.s32.totalorder %s3140_s12, %s4407_s21 }
 0x4e0   : > { %p3142_p10 = scmp.ne.s32.totalorder %s3140_s12, %s3141_s29  ;;  %p3147_p1 = scmp.lt.s32.totalorder %s3145_s27, %s3141_s29 }
 0x4e2   : > { %p3143_p2 = pnand %p3142_p10, %p3336_p11  ;;  %p3148_p4 = por %p3147_p1, %p3146_p0 }
 0x4e4   : > { %p3144_p9 = pneg %p3143_p2 }
 0x4e6   : > { %p3149_p7 = pnand %p3148_p4, %p3144_p9 }
 0x4f7   : > { %v2302_v50 = vpop.f32.mrf.mxu3 }
 0x4f8   : > { %v2303_v3 = vadd.f32 %v2880_v19, %v2302_v50 }
 0x4fa   : > { %2309 = vst.msk [vmem:[%s4255_s10 + $0x10] sm:$0xff] %vm576_vm0, %v2303_v3 }
 0x4ff   : > { %v2304_v11 = vpop.f32.mrf.mxu3 }
 0x500   : > { %v2305_v51 = vadd.f32 %v2880_v19, %v2304_v11 }
 0x502   : > { %2310 = vst.msk [vmem:[%s4255_s10 + $0x18] sm:$0xff] %vm576_vm0, %v2305_v51 }
 0x503   : > { %3152 = shalt.err (!%p3149_p7)
}
 0x504   : > { %2790 = dma.vmem_to_hbm [thread:$0]  (%p3336_p11), %s2335_s30, 512, %s2337_s25, %s2312_s22, %s3213_s16, %s3213_s16, %s3206_s11  }
 0x505 PF: > { %s4408_s1 = sld [smem:[#allocation19_spill]]  ;;  %p4410_p5 = scmp.ge.s32.totalorder %s3199_s28, 2 }
 0x507   : > { %p2804_p8 = pnand %p4410_p5, %p3340_p12 }
 0x509   : > { %p2805_p13 = pneg %p2804_p8 }
 0x50b   : > { %s2385_s13 = sand.u32 1, %s4408_s1  }
 0x50c   : > { %s2386_s19 = scalar_lea.sflag [#allocation8], %s2385_s13 }
 0x50d   : > { %3178 = dma.done.wait (%p2805_p13), %s2386_s19, 512  }
 0x50e   : > { %3180 = vsyncadd (%p2805_p13), %s2386_s19, 4294966784  ;;  %s4411_s12 = sadd.s32 4294967294, %s3199_s28  }
 0x50f   : > { %s2395_s29 = sand.u32 1, %s4411_s12  }
 0x510   : > { %s2396_s17 = scalar_lea.sflag [#allocation13], %s2395_s29 }
 0x511   : > { %3182 = dma.done.wait (%p2805_p13), %s2396_s17, 4096  }
 0x512   : > { %3184 = vsyncadd (%p2805_p13), %s2396_s17, 4294963200  ;;  %s4412_s28 = sld [smem:[#allocation21_spill]]  ;;  %s4415_s25 = smov %s3191_s26 }
 0x513   : > { %s4413_s11 = sld [smem:[#allocation20_spill]] }
 0x514   : > { %s4414_s27 = sld [smem:[#allocation22_spill]] }
 0x518   : > { %p33_p11 = scmp.ge.s32.totalorder %s4412_s28, 4  }
 0x519   : > { %s4416_s26 = smov %s4413_s11 }
 0x51a   :  { %35 = sbr.rel (!%p33_p11) target bundleno = 15 (0xf), region = 169 }
 0x51f   :  { %2412 = vsyncpa [#allocation7], 1 }
 0x520   :  { %2414 = vsyncpa [#allocation7 + $0x1], 1 }
 0x521   :  { %2415 = vsyncpa [#allocation10], 1 }
 0x522   :  { %2417 = vsyncpa [#allocation10 + $0x1], 1 }
 0x523   :  { %2418 = vsyncpa [#allocation8], 1 }
 0x524   :  { %2420 = vsyncpa [#allocation8 + $0x1], 1 }
 0x525   :  { %2421 = vsyncpa [#allocation13], 1 }
 0x526   :  { %2423 = vsyncpa [#allocation13 + $0x1], 1 }

</bundles_post_ra>
